<compile_context>
chip_gen: v6e
topology: v6e:2x2x1
jax: 0.10.0
libtpu: 0.0.40
codegen_flags: <defaults>
</compile_context>

<pallas_src>
import functools

import jax
import jax.numpy as jnp
from jax.experimental import pallas as pl
from jax.experimental.pallas import tpu as pltpu

CHANNEL_SIZES = [128, 256, 512]
LANE = 128


def _round_up(x, m):
    return (x + m - 1) // m * m


def _vmem_budget_bytes():
    """Per-generation scoped-VMEM budget (v7x: 64 MiB physical, v5e/v6e: 128 MiB)."""
    try:
        kind = jax.devices()[0].device_kind.lower()
    except Exception:
        kind = ""
    if "v7" in kind:
        return 48 * 1024 * 1024
    if "v5" in kind or "v6" in kind:
        return 96 * 1024 * 1024
    return 32 * 1024 * 1024  # unknown generation: stay conservative


def _pick_tk(K):
    if K % LANE == 0:
        for tk in (512, 384, 256, 128):
            if K % tk == 0:
                return tk
    return K  # tiny / ragged K (layer 1: 27 or 36): one full-K block, no padding


def _pick_tm(Mp, K, TK, Cout, budget, need_two):
    """Largest M tile fitting the VMEM budget; when `need_two`, prefer >=2 M
    tiles so v7x's second TensorCore gets work on the 'parallel' M axis."""
    fixed = 2 * K * Cout * 2  # resident bf16 B, double-buffered
    cap = (budget * 3) // 4
    best_single = None
    for tm in (2048, 1024, 512, 256, 128, 64, 32, 16, 8):
        if Mp % tm:
            continue
        per = 2 * tm * TK * 2 + 2 * tm * Cout * 2 + tm * Cout * 4 + fixed
        if per > cap:
            continue
        if need_two and Mp // tm < 2:
            if best_single is None:
                best_single = tm
            continue
        return tm
    return best_single if best_single is not None else 8


# ---------------------------------------------------------------------------
# Pallas kernels
# ---------------------------------------------------------------------------
def _matmul_bias_relu_kernel(a_ref, b_ref, bias_ref, o_ref, acc_ref, *, tk, nk):
    """relu(A @ B + bias) with f32 VMEM accumulation and bf16 output.

    Grid = (branch G ["parallel"], M tiles ["parallel"], K tiles ["arbitrary"]).
    B stays VMEM-resident per branch (its index map ignores m/k); the K tile is
    sliced in-kernel.  No zero-init: the first K step writes the accumulator.
    """
    k = pl.program_id(2)

    if nk == 1:
        b_blk = b_ref[...]
    else:
        # nk > 1 only when K % 128 == 0, so k*tk is 128-aligned.
        b_blk = b_ref[pl.ds(pl.multiple_of(k * tk, LANE), tk), :]

    prod = jnp.dot(a_ref[...], b_blk, preferred_element_type=jnp.float32)

    @pl.when(k == 0)
    def _():
        acc_ref[...] = prod

    @pl.when(k > 0)
    def _():
        acc_ref[...] += prod

    @pl.when(k == nk - 1)
    def _():
        o_ref[...] = jnp.maximum(acc_ref[...] + bias_ref[...], 0.0).astype(o_ref.dtype)


def _fuse_pool_kernel(f_ref, e_ref, o_ref, *, inv_hw):
    """Fuse (add) the two branch feature maps, accumulate spatial sums over HW
    tiles, then mean + L2-normalize at the last tile.  Grid = (HW tiles,)."""
    t = pl.program_id(0)
    part = jnp.sum(
        f_ref[...].astype(jnp.float32) + e_ref[...].astype(jnp.float32), axis=1
    )  # (N, C) f32

    @pl.when(t == 0)
    def _():
        o_ref[...] = part

    @pl.when(t > 0)
    def _():
        o_ref[...] += part

    @pl.when(t == pl.num_programs(0) - 1)
    def _():
        pooled = o_ref[...] * inv_hw
        inv_norm = jax.lax.rsqrt(
            jnp.sum(pooled * pooled, axis=-1, keepdims=True) + 1e-12
        )
        o_ref[...] = pooled * inv_norm


# ---------------------------------------------------------------------------
# Pallas wrappers
# ---------------------------------------------------------------------------
def matmul_bias_relu(a, b, bias):
    """relu(a @ b + bias) per branch.

    a: (G, M, K) bf16, b: (G, K, Cout) bf16, bias: (G, Cout) f32
    -> (G, M, Cout) bf16.
    """
    G, M, K = a.shape
    Cout = b.shape[-1]
    budget = _vmem_budget_bytes()

    TK = _pick_tk(K)
    nk = K // TK

    Mp = _round_up(M, 8)
    if Mp != M:  # rare ragged M: pad a few rows only
        a = jnp.pad(a, ((0, 0), (0, Mp - M), (0, 0)))
    TM = _pick_tm(Mp, K, TK, Cout, budget, need_two=(G == 1))

    bias3 = bias.reshape(G, 1, Cout).astype(jnp.float32)
    kernel = functools.partial(_matmul_bias_relu_kernel, tk=TK, nk=nk)

    out = pl.pallas_call(
        kernel,
        out_shape=jax.ShapeDtypeStruct((G, Mp, Cout), jnp.bfloat16),
        grid_spec=pltpu.PrefetchScalarGridSpec(
            num_scalar_prefetch=0,
            grid=(G, Mp // TM, nk),
            in_specs=[
                pl.BlockSpec((None, TM, TK), lambda g, m, k: (g, m, k)),
                # Whole per-branch weight stays VMEM-resident across all (m, k).
                pl.BlockSpec((None, K, Cout), lambda g, m, k: (g, 0, 0)),
                pl.BlockSpec((None, 1, Cout), lambda g, m, k: (g, 0, 0)),
            ],
            out_specs=pl.BlockSpec((None, TM, Cout), lambda g, m, k: (g, m, 0)),
            scratch_shapes=[pltpu.VMEM((TM, Cout), jnp.float32)],
        ),
        compiler_params=pltpu.CompilerParams(
            dimension_semantics=("parallel", "parallel", "arbitrary"),
            vmem_limit_bytes=budget,
        ),
        cost_estimate=pl.CostEstimate(
            flops=2 * G * Mp * K * Cout,
            transcendentals=0,
            bytes_accessed=G * (Mp * K * 2 + K * Cout * 2 + Cout * 4 + Mp * Cout * 2),
        ),
    )(a, b, bias3)
    return out[:, :M] if Mp != M else out


def _pick_hw_tile(HW, N, C, budget_bytes):
    # 2 bf16 inputs x 2 pipeline buffers => 8*N*C bytes per HW row of the tile.
    cap = max(8, budget_bytes // (8 * N * C))
    if HW <= cap:
        return HW
    t = (cap // 8) * 8
    while t >= 8:
        if HW % t == 0:
            return t
        t -= 8
    return HW  # TODO(synk): ragged HW fallback loads the full feature maps


def fuse_pool_normalize(f_feat, e_feat):
    """f_feat, e_feat: (N, H, W, C) bf16 -> (N, C) f32 L2-normalized descriptor."""
    N, H, W, C = f_feat.shape
    HW = H * W
    f3 = f_feat.reshape(N, HW, C)
    e3 = e_feat.reshape(N, HW, C)

    budget = _vmem_budget_bytes()
    THW = _pick_hw_tile(HW, N, C, budget_bytes=min(budget // 2, 16 * 1024 * 1024))
    kernel = functools.partial(_fuse_pool_kernel, inv_hw=1.0 / HW)
    return pl.pallas_call(
        kernel,
        out_shape=jax.ShapeDtypeStruct((N, C), jnp.float32),
        grid_spec=pltpu.PrefetchScalarGridSpec(
            num_scalar_prefetch=0,
            grid=(HW // THW,),
            in_specs=[
                pl.BlockSpec((N, THW, C), lambda t: (0, t, 0)),
                pl.BlockSpec((N, THW, C), lambda t: (0, t, 0)),
            ],
            out_specs=pl.BlockSpec((N, C), lambda t: (0, 0)),
        ),
        compiler_params=pltpu.CompilerParams(
            dimension_semantics=("arbitrary",),
            vmem_limit_bytes=budget,
        ),
        cost_estimate=pl.CostEstimate(
            flops=3 * N * HW * C,
            transcendentals=0,
            bytes_accessed=2 * N * HW * C * 2 + N * C * 4,
        ),
    )(f3, e3)


# ---------------------------------------------------------------------------
# Conv layer = im2col (glue, bf16, unpadded K) + Pallas matmul kernel
# ---------------------------------------------------------------------------
def im2col_bf16(x, k=3, stride=2, pad=1):
    """x (B,H,W,C) -> bf16 patch matrix (B*Ho*Wo, k*k*C), no K padding.

    # TODO(synk): build the 3x3 patches in-kernel (direct conv via row-band DMA
    # from HBM) to remove this ~2.25x HBM write + read; bf16 + unpadded K
    # already roughly halves the round trip vs the previous version.
    """
    B, H, W, C = x.shape
    xb = x.astype(jnp.bfloat16)
    xp = jnp.pad(xb, ((0, 0), (pad, pad), (pad, pad), (0, 0)))
    Ho = (H + 2 * pad - k) // stride + 1
    Wo = (W + 2 * pad - k) // stride + 1
    cols = [
        xp[:, dy : dy + Ho * stride : stride, dx : dx + Wo * stride : stride, :]
        for dy in range(k)
        for dx in range(k)
    ]
    patches = jnp.concatenate(cols, axis=-1)  # (B, Ho, Wo, k*k*C)
    return patches.reshape(B * Ho * Wo, k * k * C), (B, Ho, Wo)


def conv_relu(x, w_stack, b_stack):
    """3x3 / stride-2 / pad-1 conv + bias + ReLU for G stacked branches (NHWC).

    x: (G*N, H, W, Cin); w_stack: (G, 9*Cin, Cout); b_stack: (G, Cout).
    Returns (G*N, Ho, Wo, Cout) bf16.
    """
    G = w_stack.shape[0]
    patches, (B, Ho, Wo) = im2col_bf16(x)
    M = (B // G) * Ho * Wo
    a = patches.reshape(G, M, -1)
    y = matmul_bias_relu(a, w_stack.astype(jnp.bfloat16), b_stack)
    return y.reshape(B, Ho, Wo, -1)


# ---------------------------------------------------------------------------
# Parameters (deterministic, synthetic)
# ---------------------------------------------------------------------------
def init_branch(key, in_ch):
    params = []
    chans = [in_ch] + CHANNEL_SIZES
    for i in range(len(CHANNEL_SIZES)):
        key, kw = jax.random.split(key)
        fan_in = 3 * 3 * chans[i]
        w = jax.random.normal(kw, (fan_in, chans[i + 1]), jnp.float32)
        w = w * (1.0 / jnp.sqrt(jnp.float32(fan_in)))
        b = jnp.zeros((chans[i + 1],), jnp.float32)
        params.append((w, b))
    return params


def init_params(key, frame_ch=3, event_ch=4):
    kf, ke = jax.random.split(key)
    return {
        "frame": init_branch(kf, frame_ch),
        "event": init_branch(ke, event_ch),
    }


# ---------------------------------------------------------------------------
# Net.forward (use_vpr=False)
# ---------------------------------------------------------------------------
def net_forward(params, frame_nchw, event_nchw):
    # NCHW (PyTorch) -> NHWC (kernel layout)
    f = jnp.transpose(frame_nchw, (0, 2, 3, 1))
    e = jnp.transpose(event_nchw, (0, 2, 3, 1))
    N = f.shape[0]

    # Layer 1: branches have different input channels -> two G=1 calls.
    wf1, bf1 = params["frame"][0]
    we1, be1 = params["event"][0]
    f = conv_relu(f, wf1[None], bf1[None])
    e = conv_relu(e, we1[None], be1[None])

    # Layers 2..: identical shapes -> stack both branches along a size-2
    # 'parallel' grid axis (one pallas_call per layer, megacore-friendly).
    x = jnp.concatenate([f, e], axis=0)  # (2N, H, W, C), bf16
    for (wf, bf), (we, be) in zip(params["frame"][1:], params["event"][1:]):
        w = jnp.stack([wf, we], axis=0)  # (2, K, Cout)
        b = jnp.stack([bf, be], axis=0)  # (2, Cout)
        x = conv_relu(x, w, b)

    return fuse_pool_normalize(x[:N], x[N:])  # (N, 512) f32 descriptor


# ---------------------------------------------------------------------------
if __name__ == "__main__":
    key = jax.random.PRNGKey(0)
    k_frame, k_event, k_params = jax.random.split(key, 3)

    # PyTorch-convention NCHW inputs: batch=2, frame RGB, 4-bin event volume.
    frame_batch = jax.random.normal(k_frame, (2, 3, 16, 16), jnp.float32)
    event_volume_batch = jax.random.normal(k_event, (2, 4, 16, 16), jnp.float32)

    params = init_params(k_params, frame_ch=3, event_ch=4)

    fwd = jax.jit(functools.partial(net_forward, params))
    out = fwd(frame_batch, event_volume_batch)
    jax.block_until_ready(out)

    assert out.shape == (2, CHANNEL_SIZES[-1]), out.shape
    assert bool(jnp.all(jnp.isfinite(out)))
    norms = jnp.linalg.norm(out, axis=-1)
    assert bool(jnp.all(jnp.abs(norms - 1.0) < 1e-2)), norms
    print("KERNEL_OK")
</pallas_src>

<mosaic_0001>
module attributes {stable_mosaic.version = 11 : i64} {
  func.func @_matmul_bias_relu_kernel(%arg0: i32, %arg1: i32, %arg2: i32, %arg3: memref<1x64x27xbf16, #tpu.memory_space<vmem>>, %arg4: memref<1x27x128xbf16, #tpu.memory_space<vmem>>, %arg5: memref<1x1x128xf32, #tpu.memory_space<vmem>>, %arg6: memref<1x64x128xbf16, #tpu.memory_space<vmem>>, %arg7: memref<64x128xf32, #tpu.memory_space<vmem>>) attributes {dimension_semantics = [#tpu.dimension_semantics<parallel>, #tpu.dimension_semantics<parallel>, #tpu.dimension_semantics<arbitrary>], iteration_bounds = array<i64: 1, 2, 1>, scalar_prefetch = 0 : i64, scratch_operands = 1 : i64, tpu.core_type = #tpu.core_type<tc>, window_params = [{transform_indices = @transform_0, window_bounds = array<i64: 1, 64, 27>}, {transform_indices = @transform_1, window_bounds = array<i64: 1, 27, 128>}, {transform_indices = @transform_2, window_bounds = array<i64: 1, 1, 128>}, {transform_indices = @transform_3, window_bounds = array<i64: 1, 64, 128>}]} {
    %c0 = arith.constant 0 : index
    %c0_0 = arith.constant 0 : index
    %c0_1 = arith.constant 0 : index
    %0 = vector.load %arg4[%c0, %c0_0, %c0_1] : memref<1x27x128xbf16, #tpu.memory_space<vmem>>, vector<1x27x128xbf16>
    %1 = vector.shape_cast %0 : vector<1x27x128xbf16> to vector<27x128xbf16>
    %c0_2 = arith.constant 0 : index
    %c0_3 = arith.constant 0 : index
    %c0_4 = arith.constant 0 : index
    %2 = vector.load %arg3[%c0_2, %c0_3, %c0_4] : memref<1x64x27xbf16, #tpu.memory_space<vmem>>, vector<1x64x27xbf16>
    %3 = vector.shape_cast %2 : vector<1x64x27xbf16> to vector<64x27xbf16>
    %cst = arith.constant dense<0.000000e+00> : vector<64x128xf32>
    %4 = tpu.matmul %3, %1, %cst {dimension_numbers = #tpu.dot_dimension_numbers<[1], [0], [0], [1], [0, 0, 1, 1], [], []>} : vector<64x27xbf16>, vector<27x128xbf16>, vector<64x128xf32> -> vector<64x128xf32>
    %c0_i32 = arith.constant 0 : i32
    %5 = arith.cmpi eq, %arg2, %c0_i32 : i32
    %6 = arith.extui %5 : i1 to i32
    %c0_i32_5 = arith.constant 0 : i32
    %7 = arith.cmpi ne, %6, %c0_i32_5 : i32
    scf.if %7 {
      %c0_10 = arith.constant 0 : index
      %c0_11 = arith.constant 0 : index
      %14 = vector.load %arg7[%c0_10, %c0_11] : memref<64x128xf32, #tpu.memory_space<vmem>>, vector<64x128xf32>
      tpu.vector_store %arg7[%c0_10, %c0_11], %4 {strides = array<i32>} : memref<64x128xf32, #tpu.memory_space<vmem>>, vector<64x128xf32>,
    } else {
    }
    %c0_i32_6 = arith.constant 0 : i32
    %8 = arith.cmpi sgt, %arg2, %c0_i32_6 : i32
    %9 = arith.extui %8 : i1 to i32
    %c0_i32_7 = arith.constant 0 : i32
    %10 = arith.cmpi ne, %9, %c0_i32_7 : i32
    scf.if %10 {
      %c0_10 = arith.constant 0 : index
      %c0_11 = arith.constant 0 : index
      %14 = vector.load %arg7[%c0_10, %c0_11] : memref<64x128xf32, #tpu.memory_space<vmem>>, vector<64x128xf32>
      %15 = arith.addf %14, %4 : vector<64x128xf32>
      %c0_12 = arith.constant 0 : index
      %c0_13 = arith.constant 0 : index
      %16 = vector.load %arg7[%c0_12, %c0_13] : memref<64x128xf32, #tpu.memory_space<vmem>>, vector<64x128xf32>
      tpu.vector_store %arg7[%c0_12, %c0_13], %15 {strides = array<i32>} : memref<64x128xf32, #tpu.memory_space<vmem>>, vector<64x128xf32>,
    } else {
    }
    %c0_i32_8 = arith.constant 0 : i32
    %11 = arith.cmpi eq, %arg2, %c0_i32_8 : i32
    %12 = arith.extui %11 : i1 to i32
    %c0_i32_9 = arith.constant 0 : i32
    %13 = arith.cmpi ne, %12, %c0_i32_9 : i32
    scf.if %13 {
      %c0_10 = arith.constant 0 : index
      %c0_11 = arith.constant 0 : index
      %14 = vector.load %arg7[%c0_10, %c0_11] : memref<64x128xf32, #tpu.memory_space<vmem>>, vector<64x128xf32>
      %c0_12 = arith.constant 0 : index
      %c0_13 = arith.constant 0 : index
      %c0_14 = arith.constant 0 : index
      %15 = vector.load %arg5[%c0_12, %c0_13, %c0_14] : memref<1x1x128xf32, #tpu.memory_space<vmem>>, vector<1x1x128xf32>
      %16 = vector.shape_cast %15 : vector<1x1x128xf32> to vector<1x128xf32>
      %17 = vector.broadcast %16 : vector<1x128xf32> to vector<64x128xf32>
      %18 = arith.addf %14, %17 : vector<64x128xf32>
      %cst_15 = arith.constant 0.000000e+00 : f32
      %19 = vector.broadcast %cst_15 : f32 to vector<64x128xf32>
      %20 = arith.maximumf %18, %19 : vector<64x128xf32>
      %21 = arith.truncf %20 : vector<64x128xf32> to vector<64x128xbf16>
      %c0_16 = arith.constant 0 : index
      %c0_17 = arith.constant 0 : index
      %c0_18 = arith.constant 0 : index
      %22 = vector.load %arg6[%c0_16, %c0_17, %c0_18] : memref<1x64x128xbf16, #tpu.memory_space<vmem>>, vector<1x64x128xbf16>
      %23 = vector.shape_cast %22 : vector<1x64x128xbf16> to vector<64x128xbf16>
      %24 = vector.shape_cast %21 : vector<64x128xbf16> to vector<1x64x128xbf16>
      tpu.vector_store %arg6[%c0_16, %c0_17, %c0_18], %24 {strides = array<i32>} : memref<1x64x128xbf16, #tpu.memory_space<vmem>>, vector<1x64x128xbf16>,
    } else {
    }
    return
  }
  func.func @transform_0(%arg0: i32, %arg1: i32, %arg2: i32) -> (i32, i32, i32) {
    %c0_i32 = arith.constant 0 : i32
    return %arg0, %arg1, %arg2 : i32, i32, i32
  }
  func.func @transform_1(%arg0: i32, %arg1: i32, %arg2: i32) -> (i32, i32, i32) {
    %c0_i32 = arith.constant 0 : i32
    %c0_i32_0 = arith.constant 0 : i32
    %c0_i32_1 = arith.constant 0 : i32
    return %arg0, %c0_i32, %c0_i32_0 : i32, i32, i32
  }
  func.func @transform_2(%arg0: i32, %arg1: i32, %arg2: i32) -> (i32, i32, i32) {
    %c0_i32 = arith.constant 0 : i32
    %c0_i32_0 = arith.constant 0 : i32
    %c0_i32_1 = arith.constant 0 : i32
    return %arg0, %c0_i32, %c0_i32_0 : i32, i32, i32
  }
  func.func @transform_3(%arg0: i32, %arg1: i32, %arg2: i32) -> (i32, i32, i32) {
    %c0_i32 = arith.constant 0 : i32
    %c0_i32_0 = arith.constant 0 : i32
    return %arg0, %arg1, %c0_i32 : i32, i32, i32
  }
}

module attributes {stable_mosaic.version = 11 : i64} {
  func.func @_matmul_bias_relu_kernel(%arg0: i32, %arg1: i32, %arg2: i32, %arg3: memref<1x64x36xbf16, #tpu.memory_space<vmem>>, %arg4: memref<1x36x128xbf16, #tpu.memory_space<vmem>>, %arg5: memref<1x1x128xf32, #tpu.memory_space<vmem>>, %arg6: memref<1x64x128xbf16, #tpu.memory_space<vmem>>, %arg7: memref<64x128xf32, #tpu.memory_space<vmem>>) attributes {dimension_semantics = [#tpu.dimension_semantics<parallel>, #tpu.dimension_semantics<parallel>, #tpu.dimension_semantics<arbitrary>], iteration_bounds = array<i64: 1, 2, 1>, scalar_prefetch = 0 : i64, scratch_operands = 1 : i64, tpu.core_type = #tpu.core_type<tc>, window_params = [{transform_indices = @transform_0, window_bounds = array<i64: 1, 64, 36>}, {transform_indices = @transform_1, window_bounds = array<i64: 1, 36, 128>}, {transform_indices = @transform_2, window_bounds = array<i64: 1, 1, 128>}, {transform_indices = @transform_3, window_bounds = array<i64: 1, 64, 128>}]} {
    %c0 = arith.constant 0 : index
    %c0_0 = arith.constant 0 : index
    %c0_1 = arith.constant 0 : index
    %0 = vector.load %arg4[%c0, %c0_0, %c0_1] : memref<1x36x128xbf16, #tpu.memory_space<vmem>>, vector<1x36x128xbf16>
    %1 = vector.shape_cast %0 : vector<1x36x128xbf16> to vector<36x128xbf16>
    %c0_2 = arith.constant 0 : index
    %c0_3 = arith.constant 0 : index
    %c0_4 = arith.constant 0 : index
    %2 = vector.load %arg3[%c0_2, %c0_3, %c0_4] : memref<1x64x36xbf16, #tpu.memory_space<vmem>>, vector<1x64x36xbf16>
    %3 = vector.shape_cast %2 : vector<1x64x36xbf16> to vector<64x36xbf16>
    %cst = arith.constant dense<0.000000e+00> : vector<64x128xf32>
    %4 = tpu.matmul %3, %1, %cst {dimension_numbers = #tpu.dot_dimension_numbers<[1], [0], [0], [1], [0, 0, 1, 1], [], []>} : vector<64x36xbf16>, vector<36x128xbf16>, vector<64x128xf32> -> vector<64x128xf32>
    %c0_i32 = arith.constant 0 : i32
    %5 = arith.cmpi eq, %arg2, %c0_i32 : i32
    %6 = arith.extui %5 : i1 to i32
    %c0_i32_5 = arith.constant 0 : i32
    %7 = arith.cmpi ne, %6, %c0_i32_5 : i32
    scf.if %7 {
      %c0_10 = arith.constant 0 : index
      %c0_11 = arith.constant 0 : index
      %14 = vector.load %arg7[%c0_10, %c0_11] : memref<64x128xf32, #tpu.memory_space<vmem>>, vector<64x128xf32>
      tpu.vector_store %arg7[%c0_10, %c0_11], %4 {strides = array<i32>} : memref<64x128xf32, #tpu.memory_space<vmem>>, vector<64x128xf32>,
    } else {
    }
    %c0_i32_6 = arith.constant 0 : i32
    %8 = arith.cmpi sgt, %arg2, %c0_i32_6 : i32
    %9 = arith.extui %8 : i1 to i32
    %c0_i32_7 = arith.constant 0 : i32
    %10 = arith.cmpi ne, %9, %c0_i32_7 : i32
    scf.if %10 {
      %c0_10 = arith.constant 0 : index
      %c0_11 = arith.constant 0 : index
      %14 = vector.load %arg7[%c0_10, %c0_11] : memref<64x128xf32, #tpu.memory_space<vmem>>, vector<64x128xf32>
      %15 = arith.addf %14, %4 : vector<64x128xf32>
      %c0_12 = arith.constant 0 : index
      %c0_13 = arith.constant 0 : index
      %16 = vector.load %arg7[%c0_12, %c0_13] : memref<64x128xf32, #tpu.memory_space<vmem>>, vector<64x128xf32>
      tpu.vector_store %arg7[%c0_12, %c0_13], %15 {strides = array<i32>} : memref<64x128xf32, #tpu.memory_space<vmem>>, vector<64x128xf32>,
    } else {
    }
    %c0_i32_8 = arith.constant 0 : i32
    %11 = arith.cmpi eq, %arg2, %c0_i32_8 : i32
    %12 = arith.extui %11 : i1 to i32
    %c0_i32_9 = arith.constant 0 : i32
    %13 = arith.cmpi ne, %12, %c0_i32_9 : i32
    scf.if %13 {
      %c0_10 = arith.constant 0 : index
      %c0_11 = arith.constant 0 : index
      %14 = vector.load %arg7[%c0_10, %c0_11] : memref<64x128xf32, #tpu.memory_space<vmem>>, vector<64x128xf32>
      %c0_12 = arith.constant 0 : index
      %c0_13 = arith.constant 0 : index
      %c0_14 = arith.constant 0 : index
      %15 = vector.load %arg5[%c0_12, %c0_13, %c0_14] : memref<1x1x128xf32, #tpu.memory_space<vmem>>, vector<1x1x128xf32>
      %16 = vector.shape_cast %15 : vector<1x1x128xf32> to vector<1x128xf32>
      %17 = vector.broadcast %16 : vector<1x128xf32> to vector<64x128xf32>
      %18 = arith.addf %14, %17 : vector<64x128xf32>
      %cst_15 = arith.constant 0.000000e+00 : f32
      %19 = vector.broadcast %cst_15 : f32 to vector<64x128xf32>
      %20 = arith.maximumf %18, %19 : vector<64x128xf32>
      %21 = arith.truncf %20 : vector<64x128xf32> to vector<64x128xbf16>
      %c0_16 = arith.constant 0 : index
      %c0_17 = arith.constant 0 : index
      %c0_18 = arith.constant 0 : index
      %22 = vector.load %arg6[%c0_16, %c0_17, %c0_18] : memref<1x64x128xbf16, #tpu.memory_space<vmem>>, vector<1x64x128xbf16>
      %23 = vector.shape_cast %22 : vector<1x64x128xbf16> to vector<64x128xbf16>
      %24 = vector.shape_cast %21 : vector<64x128xbf16> to vector<1x64x128xbf16>
      tpu.vector_store %arg6[%c0_16, %c0_17, %c0_18], %24 {strides = array<i32>} : memref<1x64x128xbf16, #tpu.memory_space<vmem>>, vector<1x64x128xbf16>,
    } else {
    }
    return
  }
  func.func @transform_0(%arg0: i32, %arg1: i32, %arg2: i32) -> (i32, i32, i32) {
    %c0_i32 = arith.constant 0 : i32
    return %arg0, %arg1, %arg2 : i32, i32, i32
  }
  func.func @transform_1(%arg0: i32, %arg1: i32, %arg2: i32) -> (i32, i32, i32) {
    %c0_i32 = arith.constant 0 : i32
    %c0_i32_0 = arith.constant 0 : i32
    %c0_i32_1 = arith.constant 0 : i32
    return %arg0, %c0_i32, %c0_i32_0 : i32, i32, i32
  }
  func.func @transform_2(%arg0: i32, %arg1: i32, %arg2: i32) -> (i32, i32, i32) {
    %c0_i32 = arith.constant 0 : i32
    %c0_i32_0 = arith.constant 0 : i32
    %c0_i32_1 = arith.constant 0 : i32
    return %arg0, %c0_i32, %c0_i32_0 : i32, i32, i32
  }
  func.func @transform_3(%arg0: i32, %arg1: i32, %arg2: i32) -> (i32, i32, i32) {
    %c0_i32 = arith.constant 0 : i32
    %c0_i32_0 = arith.constant 0 : i32
    return %arg0, %arg1, %c0_i32 : i32, i32, i32
  }
}

module attributes {stable_mosaic.version = 11 : i64} {
  func.func @_matmul_bias_relu_kernel(%arg0: i32, %arg1: i32, %arg2: i32, %arg3: memref<1x32x384xbf16, #tpu.memory_space<vmem>>, %arg4: memref<1x1152x256xbf16, #tpu.memory_space<vmem>>, %arg5: memref<1x1x256xf32, #tpu.memory_space<vmem>>, %arg6: memref<1x32x256xbf16, #tpu.memory_space<vmem>>, %arg7: memref<32x256xf32, #tpu.memory_space<vmem>>) attributes {dimension_semantics = [#tpu.dimension_semantics<parallel>, #tpu.dimension_semantics<parallel>, #tpu.dimension_semantics<arbitrary>], iteration_bounds = array<i64: 2, 1, 3>, scalar_prefetch = 0 : i64, scratch_operands = 1 : i64, tpu.core_type = #tpu.core_type<tc>, window_params = [{transform_indices = @transform_0, window_bounds = array<i64: 1, 32, 384>}, {transform_indices = @transform_1, window_bounds = array<i64: 1, 1152, 256>}, {transform_indices = @transform_2, window_bounds = array<i64: 1, 1, 256>}, {transform_indices = @transform_3, window_bounds = array<i64: 1, 32, 256>}]} {
    %c384_i32 = arith.constant 384 : i32
    %0 = arith.muli %arg2, %c384_i32 : i32
    %1 = tpu.assume_multiple %0, 128 : i32
    %c0 = arith.constant 0 : index
    %2 = arith.index_cast %1 : i32 to index
    %c0_0 = arith.constant 0 : index
    %3 = vector.load %arg4[%c0, %2, %c0_0] : memref<1x1152x256xbf16, #tpu.memory_space<vmem>>, vector<1x384x256xbf16>
    %4 = vector.shape_cast %3 : vector<1x384x256xbf16> to vector<384x256xbf16>
    %c0_1 = arith.constant 0 : index
    %c0_2 = arith.constant 0 : index
    %c0_3 = arith.constant 0 : index
    %5 = vector.load %arg3[%c0_1, %c0_2, %c0_3] : memref<1x32x384xbf16, #tpu.memory_space<vmem>>, vector<1x32x384xbf16>
    %6 = vector.shape_cast %5 : vector<1x32x384xbf16> to vector<32x384xbf16>
    %cst = arith.constant dense<0.000000e+00> : vector<32x256xf32>
    %7 = tpu.matmul %6, %4, %cst {dimension_numbers = #tpu.dot_dimension_numbers<[1], [0], [0], [1], [0, 0, 1, 1], [], []>} : vector<32x384xbf16>, vector<384x256xbf16>, vector<32x256xf32> -> vector<32x256xf32>
    %c0_i32 = arith.constant 0 : i32
    %8 = arith.cmpi eq, %arg2, %c0_i32 : i32
    %9 = arith.extui %8 : i1 to i32
    %c0_i32_4 = arith.constant 0 : i32
    %10 = arith.cmpi ne, %9, %c0_i32_4 : i32
    scf.if %10 {
      %c0_8 = arith.constant 0 : index
      %c0_9 = arith.constant 0 : index
      %17 = vector.load %arg7[%c0_8, %c0_9] : memref<32x256xf32, #tpu.memory_space<vmem>>, vector<32x256xf32>
      tpu.vector_store %arg7[%c0_8, %c0_9], %7 {strides = array<i32>} : memref<32x256xf32, #tpu.memory_space<vmem>>, vector<32x256xf32>,
    } else {
    }
    %c0_i32_5 = arith.constant 0 : i32
    %11 = arith.cmpi sgt, %arg2, %c0_i32_5 : i32
    %12 = arith.extui %11 : i1 to i32
    %c0_i32_6 = arith.constant 0 : i32
    %13 = arith.cmpi ne, %12, %c0_i32_6 : i32
    scf.if %13 {
      %c0_8 = arith.constant 0 : index
      %c0_9 = arith.constant 0 : index
      %17 = vector.load %arg7[%c0_8, %c0_9] : memref<32x256xf32, #tpu.memory_space<vmem>>, vector<32x256xf32>
      %18 = arith.addf %17, %7 : vector<32x256xf32>
      %c0_10 = arith.constant 0 : index
      %c0_11 = arith.constant 0 : index
      %19 = vector.load %arg7[%c0_10, %c0_11] : memref<32x256xf32, #tpu.memory_space<vmem>>, vector<32x256xf32>
      tpu.vector_store %arg7[%c0_10, %c0_11], %18 {strides = array<i32>} : memref<32x256xf32, #tpu.memory_space<vmem>>, vector<32x256xf32>,
    } else {
    }
    %c2_i32 = arith.constant 2 : i32
    %14 = arith.cmpi eq, %arg2, %c2_i32 : i32
    %15 = arith.extui %14 : i1 to i32
    %c0_i32_7 = arith.constant 0 : i32
    %16 = arith.cmpi ne, %15, %c0_i32_7 : i32
    scf.if %16 {
      %c0_8 = arith.constant 0 : index
      %c0_9 = arith.constant 0 : index
      %17 = vector.load %arg7[%c0_8, %c0_9] : memref<32x256xf32, #tpu.memory_space<vmem>>, vector<32x256xf32>
      %c0_10 = arith.constant 0 : index
      %c0_11 = arith.constant 0 : index
      %c0_12 = arith.constant 0 : index
      %18 = vector.load %arg5[%c0_10, %c0_11, %c0_12] : memref<1x1x256xf32, #tpu.memory_space<vmem>>, vector<1x1x256xf32>
      %19 = vector.shape_cast %18 : vector<1x1x256xf32> to vector<1x256xf32>
      %20 = vector.broadcast %19 : vector<1x256xf32> to vector<32x256xf32>
      %21 = arith.addf %17, %20 : vector<32x256xf32>
      %cst_13 = arith.constant 0.000000e+00 : f32
      %22 = vector.broadcast %cst_13 : f32 to vector<32x256xf32>
      %23 = arith.maximumf %21, %22 : vector<32x256xf32>
      %24 = arith.truncf %23 : vector<32x256xf32> to vector<32x256xbf16>
      %c0_14 = arith.constant 0 : index
      %c0_15 = arith.constant 0 : index
      %c0_16 = arith.constant 0 : index
      %25 = vector.load %arg6[%c0_14, %c0_15, %c0_16] : memref<1x32x256xbf16, #tpu.memory_space<vmem>>, vector<1x32x256xbf16>
      %26 = vector.shape_cast %25 : vector<1x32x256xbf16> to vector<32x256xbf16>
      %27 = vector.shape_cast %24 : vector<32x256xbf16> to vector<1x32x256xbf16>
      tpu.vector_store %arg6[%c0_14, %c0_15, %c0_16], %27 {strides = array<i32>} : memref<1x32x256xbf16, #tpu.memory_space<vmem>>, vector<1x32x256xbf16>,
    } else {
    }
    return
  }
  func.func @transform_0(%arg0: i32, %arg1: i32, %arg2: i32) -> (i32, i32, i32) {
    %c0_i32 = arith.constant 0 : i32
    return %arg0, %arg1, %arg2 : i32, i32, i32
  }
  func.func @transform_1(%arg0: i32, %arg1: i32, %arg2: i32) -> (i32, i32, i32) {
    %c0_i32 = arith.constant 0 : i32
    %c0_i32_0 = arith.constant 0 : i32
    %c0_i32_1 = arith.constant 0 : i32
    return %arg0, %c0_i32, %c0_i32_0 : i32, i32, i32
  }
  func.func @transform_2(%arg0: i32, %arg1: i32, %arg2: i32) -> (i32, i32, i32) {
    %c0_i32 = arith.constant 0 : i32
    %c0_i32_0 = arith.constant 0 : i32
    %c0_i32_1 = arith.constant 0 : i32
    return %arg0, %c0_i32, %c0_i32_0 : i32, i32, i32
  }
  func.func @transform_3(%arg0: i32, %arg1: i32, %arg2: i32) -> (i32, i32, i32) {
    %c0_i32 = arith.constant 0 : i32
    %c0_i32_0 = arith.constant 0 : i32
    return %arg0, %arg1, %c0_i32 : i32, i32, i32
  }
}

module attributes {stable_mosaic.version = 11 : i64} {
  func.func @_matmul_bias_relu_kernel(%arg0: i32, %arg1: i32, %arg2: i32, %arg3: memref<1x8x384xbf16, #tpu.memory_space<vmem>>, %arg4: memref<1x2304x512xbf16, #tpu.memory_space<vmem>>, %arg5: memref<1x1x512xf32, #tpu.memory_space<vmem>>, %arg6: memref<1x8x512xbf16, #tpu.memory_space<vmem>>, %arg7: memref<8x512xf32, #tpu.memory_space<vmem>>) attributes {dimension_semantics = [#tpu.dimension_semantics<parallel>, #tpu.dimension_semantics<parallel>, #tpu.dimension_semantics<arbitrary>], iteration_bounds = array<i64: 2, 1, 6>, scalar_prefetch = 0 : i64, scratch_operands = 1 : i64, tpu.core_type = #tpu.core_type<tc>, window_params = [{transform_indices = @transform_0, window_bounds = array<i64: 1, 8, 384>}, {transform_indices = @transform_1, window_bounds = array<i64: 1, 2304, 512>}, {transform_indices = @transform_2, window_bounds = array<i64: 1, 1, 512>}, {transform_indices = @transform_3, window_bounds = array<i64: 1, 8, 512>}]} {
    %c384_i32 = arith.constant 384 : i32
    %0 = arith.muli %arg2, %c384_i32 : i32
    %1 = tpu.assume_multiple %0, 128 : i32
    %c0 = arith.constant 0 : index
    %2 = arith.index_cast %1 : i32 to index
    %c0_0 = arith.constant 0 : index
    %3 = vector.load %arg4[%c0, %2, %c0_0] : memref<1x2304x512xbf16, #tpu.memory_space<vmem>>, vector<1x384x512xbf16>
    %4 = vector.shape_cast %3 : vector<1x384x512xbf16> to vector<384x512xbf16>
    %c0_1 = arith.constant 0 : index
    %c0_2 = arith.constant 0 : index
    %c0_3 = arith.constant 0 : index
    %5 = vector.load %arg3[%c0_1, %c0_2, %c0_3] : memref<1x8x384xbf16, #tpu.memory_space<vmem>>, vector<1x8x384xbf16>
    %6 = vector.shape_cast %5 : vector<1x8x384xbf16> to vector<8x384xbf16>
    %cst = arith.constant dense<0.000000e+00> : vector<8x512xf32>
    %7 = tpu.matmul %6, %4, %cst {dimension_numbers = #tpu.dot_dimension_numbers<[1], [0], [0], [1], [0, 0, 1, 1], [], []>} : vector<8x384xbf16>, vector<384x512xbf16>, vector<8x512xf32> -> vector<8x512xf32>
    %c0_i32 = arith.constant 0 : i32
    %8 = arith.cmpi eq, %arg2, %c0_i32 : i32
    %9 = arith.extui %8 : i1 to i32
    %c0_i32_4 = arith.constant 0 : i32
    %10 = arith.cmpi ne, %9, %c0_i32_4 : i32
    scf.if %10 {
      %c0_8 = arith.constant 0 : index
      %c0_9 = arith.constant 0 : index
      %17 = vector.load %arg7[%c0_8, %c0_9] : memref<8x512xf32, #tpu.memory_space<vmem>>, vector<8x512xf32>
      tpu.vector_store %arg7[%c0_8, %c0_9], %7 {strides = array<i32>} : memref<8x512xf32, #tpu.memory_space<vmem>>, vector<8x512xf32>,
    } else {
    }
    %c0_i32_5 = arith.constant 0 : i32
    %11 = arith.cmpi sgt, %arg2, %c0_i32_5 : i32
    %12 = arith.extui %11 : i1 to i32
    %c0_i32_6 = arith.constant 0 : i32
    %13 = arith.cmpi ne, %12, %c0_i32_6 : i32
    scf.if %13 {
      %c0_8 = arith.constant 0 : index
      %c0_9 = arith.constant 0 : index
      %17 = vector.load %arg7[%c0_8, %c0_9] : memref<8x512xf32, #tpu.memory_space<vmem>>, vector<8x512xf32>
      %18 = arith.addf %17, %7 : vector<8x512xf32>
      %c0_10 = arith.constant 0 : index
      %c0_11 = arith.constant 0 : index
      %19 = vector.load %arg7[%c0_10, %c0_11] : memref<8x512xf32, #tpu.memory_space<vmem>>, vector<8x512xf32>
      tpu.vector_store %arg7[%c0_10, %c0_11], %18 {strides = array<i32>} : memref<8x512xf32, #tpu.memory_space<vmem>>, vector<8x512xf32>,
    } else {
    }
    %c5_i32 = arith.constant 5 : i32
    %14 = arith.cmpi eq, %arg2, %c5_i32 : i32
    %15 = arith.extui %14 : i1 to i32
    %c0_i32_7 = arith.constant 0 : i32
    %16 = arith.cmpi ne, %15, %c0_i32_7 : i32
    scf.if %16 {
      %c0_8 = arith.constant 0 : index
      %c0_9 = arith.constant 0 : index
      %17 = vector.load %arg7[%c0_8, %c0_9] : memref<8x512xf32, #tpu.memory_space<vmem>>, vector<8x512xf32>
      %c0_10 = arith.constant 0 : index
      %c0_11 = arith.constant 0 : index
      %c0_12 = arith.constant 0 : index
      %18 = vector.load %arg5[%c0_10, %c0_11, %c0_12] : memref<1x1x512xf32, #tpu.memory_space<vmem>>, vector<1x1x512xf32>
      %19 = vector.shape_cast %18 : vector<1x1x512xf32> to vector<1x512xf32>
      %20 = vector.broadcast %19 : vector<1x512xf32> to vector<8x512xf32>
      %21 = arith.addf %17, %20 : vector<8x512xf32>
      %cst_13 = arith.constant 0.000000e+00 : f32
      %22 = vector.broadcast %cst_13 : f32 to vector<8x512xf32>
      %23 = arith.maximumf %21, %22 : vector<8x512xf32>
      %24 = arith.truncf %23 : vector<8x512xf32> to vector<8x512xbf16>
      %c0_14 = arith.constant 0 : index
      %c0_15 = arith.constant 0 : index
      %c0_16 = arith.constant 0 : index
      %25 = vector.load %arg6[%c0_14, %c0_15, %c0_16] : memref<1x8x512xbf16, #tpu.memory_space<vmem>>, vector<1x8x512xbf16>
      %26 = vector.shape_cast %25 : vector<1x8x512xbf16> to vector<8x512xbf16>
      %27 = vector.shape_cast %24 : vector<8x512xbf16> to vector<1x8x512xbf16>
      tpu.vector_store %arg6[%c0_14, %c0_15, %c0_16], %27 {strides = array<i32>} : memref<1x8x512xbf16, #tpu.memory_space<vmem>>, vector<1x8x512xbf16>,
    } else {
    }
    return
  }
  func.func @transform_0(%arg0: i32, %arg1: i32, %arg2: i32) -> (i32, i32, i32) {
    %c0_i32 = arith.constant 0 : i32
    return %arg0, %arg1, %arg2 : i32, i32, i32
  }
  func.func @transform_1(%arg0: i32, %arg1: i32, %arg2: i32) -> (i32, i32, i32) {
    %c0_i32 = arith.constant 0 : i32
    %c0_i32_0 = arith.constant 0 : i32
    %c0_i32_1 = arith.constant 0 : i32
    return %arg0, %c0_i32, %c0_i32_0 : i32, i32, i32
  }
  func.func @transform_2(%arg0: i32, %arg1: i32, %arg2: i32) -> (i32, i32, i32) {
    %c0_i32 = arith.constant 0 : i32
    %c0_i32_0 = arith.constant 0 : i32
    %c0_i32_1 = arith.constant 0 : i32
    return %arg0, %c0_i32, %c0_i32_0 : i32, i32, i32
  }
  func.func @transform_3(%arg0: i32, %arg1: i32, %arg2: i32) -> (i32, i32, i32) {
    %c0_i32 = arith.constant 0 : i32
    %c0_i32_0 = arith.constant 0 : i32
    return %arg0, %arg1, %c0_i32 : i32, i32, i32
  }
}

module attributes {stable_mosaic.version = 11 : i64} {
  func.func @_fuse_pool_kernel(%arg0: i32, %arg1: memref<2x4x512xbf16, #tpu.memory_space<vmem>>, %arg2: memref<2x4x512xbf16, #tpu.memory_space<vmem>>, %arg3: memref<2x512xf32, #tpu.memory_space<vmem>>) attributes {dimension_semantics = [#tpu.dimension_semantics<arbitrary>], iteration_bounds = array<i64: 1>, scalar_prefetch = 0 : i64, scratch_operands = 0 : i64, tpu.core_type = #tpu.core_type<tc>, window_params = [{transform_indices = @transform_0, window_bounds = array<i64: 2, 4, 512>}, {transform_indices = @transform_1, window_bounds = array<i64: 2, 4, 512>}, {pipeline_mode = #tpu.pipeline_mode<synchronous>, transform_indices = @transform_2, window_bounds = array<i64: 2, 512>}]} {
    %c0 = arith.constant 0 : index
    %c0_0 = arith.constant 0 : index
    %c0_1 = arith.constant 0 : index
    %0 = vector.load %arg1[%c0, %c0_0, %c0_1] : memref<2x4x512xbf16, #tpu.memory_space<vmem>>, vector<2x4x512xbf16>
    %1 = arith.extf %0 : vector<2x4x512xbf16> to vector<2x4x512xf32>
    %c0_2 = arith.constant 0 : index
    %c0_3 = arith.constant 0 : index
    %c0_4 = arith.constant 0 : index
    %2 = vector.load %arg2[%c0_2, %c0_3, %c0_4] : memref<2x4x512xbf16, #tpu.memory_space<vmem>>, vector<2x4x512xbf16>
    %3 = arith.extf %2 : vector<2x4x512xbf16> to vector<2x4x512xf32>
    %4 = arith.addf %1, %3 : vector<2x4x512xf32>
    %cst = arith.constant dense<0.000000e+00> : vector<2x512xf32>
    %5 = vector.multi_reduction <add>, %4, %cst [1] : vector<2x4x512xf32> to vector<2x512xf32>
    %c0_i32 = arith.constant 0 : i32
    %6 = arith.cmpi eq, %arg0, %c0_i32 : i32
    %7 = arith.extui %6 : i1 to i32
    %c0_i32_5 = arith.constant 0 : i32
    %8 = arith.cmpi ne, %7, %c0_i32_5 : i32
    scf.if %8 {
      %c0_10 = arith.constant 0 : index
      %c0_11 = arith.constant 0 : index
      %15 = vector.load %arg3[%c0_10, %c0_11] : memref<2x512xf32, #tpu.memory_space<vmem>>, vector<2x512xf32>
      tpu.vector_store %arg3[%c0_10, %c0_11], %5 {strides = array<i32>} : memref<2x512xf32, #tpu.memory_space<vmem>>, vector<2x512xf32>,
    } else {
    }
    %c0_i32_6 = arith.constant 0 : i32
    %9 = arith.cmpi sgt, %arg0, %c0_i32_6 : i32
    %10 = arith.extui %9 : i1 to i32
    %c0_i32_7 = arith.constant 0 : i32
    %11 = arith.cmpi ne, %10, %c0_i32_7 : i32
    scf.if %11 {
      %c0_10 = arith.constant 0 : index
      %c0_11 = arith.constant 0 : index
      %15 = vector.load %arg3[%c0_10, %c0_11] : memref<2x512xf32, #tpu.memory_space<vmem>>, vector<2x512xf32>
      %16 = arith.addf %15, %5 : vector<2x512xf32>
      %c0_12 = arith.constant 0 : index
      %c0_13 = arith.constant 0 : index
      %17 = vector.load %arg3[%c0_12, %c0_13] : memref<2x512xf32, #tpu.memory_space<vmem>>, vector<2x512xf32>
      tpu.vector_store %arg3[%c0_12, %c0_13], %16 {strides = array<i32>} : memref<2x512xf32, #tpu.memory_space<vmem>>, vector<2x512xf32>,
    } else {
    }
    %c0_i32_8 = arith.constant 0 : i32
    %12 = arith.cmpi eq, %arg0, %c0_i32_8 : i32
    %13 = arith.extui %12 : i1 to i32
    %c0_i32_9 = arith.constant 0 : i32
    %14 = arith.cmpi ne, %13, %c0_i32_9 : i32
    scf.if %14 {
      %c0_10 = arith.constant 0 : index
      %c0_11 = arith.constant 0 : index
      %15 = vector.load %arg3[%c0_10, %c0_11] : memref<2x512xf32, #tpu.memory_space<vmem>>, vector<2x512xf32>
      %cst_12 = arith.constant 2.500000e-01 : f32
      %16 = vector.broadcast %cst_12 : f32 to vector<2x512xf32>
      %17 = arith.mulf %15, %16 : vector<2x512xf32>
      %18 = arith.mulf %17, %17 : vector<2x512xf32>
      %cst_13 = arith.constant dense<0.000000e+00> : vector<2xf32>
      %19 = vector.multi_reduction <add>, %18, %cst_13 [1] : vector<2x512xf32> to vector<2xf32>
      %20 = vector.shape_cast %19 : vector<2xf32> to vector<2x1xf32>
      %cst_14 = arith.constant 9.99999996E-13 : f32
      %21 = vector.broadcast %cst_14 : f32 to vector<2x1xf32>
      %22 = arith.addf %20, %21 : vector<2x1xf32>
      %23 = math.rsqrt %22 : vector<2x1xf32>
      %24 = vector.broadcast %23 : vector<2x1xf32> to vector<2x512xf32>
      %25 = arith.mulf %17, %24 : vector<2x512xf32>
      %c0_15 = arith.constant 0 : index
      %c0_16 = arith.constant 0 : index
      %26 = vector.load %arg3[%c0_15, %c0_16] : memref<2x512xf32, #tpu.memory_space<vmem>>, vector<2x512xf32>
      tpu.vector_store %arg3[%c0_15, %c0_16], %25 {strides = array<i32>} : memref<2x512xf32, #tpu.memory_space<vmem>>, vector<2x512xf32>,
    } else {
    }
    return
  }
  func.func @transform_0(%arg0: i32) -> (i32, i32, i32) {
    %c0_i32 = arith.constant 0 : i32
    %c0_i32_0 = arith.constant 0 : i32
    %c0_i32_1 = arith.constant 0 : i32
    return %c0_i32, %arg0, %c0_i32_0 : i32, i32, i32
  }
  func.func @transform_1(%arg0: i32) -> (i32, i32, i32) {
    %c0_i32 = arith.constant 0 : i32
    %c0_i32_0 = arith.constant 0 : i32
    %c0_i32_1 = arith.constant 0 : i32
    return %c0_i32, %arg0, %c0_i32_0 : i32, i32, i32
  }
  func.func @transform_2(%arg0: i32) -> (i32, i32) {
    %c0_i32 = arith.constant 0 : i32
    %c0_i32_0 = arith.constant 0 : i32
    %c0_i32_1 = arith.constant 0 : i32
    return %c0_i32, %c0_i32_0 : i32, i32
  }
}

</mosaic_0001>

<bundles_post_ra>
// kernel: net_forward.5
= control target key start
LH: loop header
LB: loop body
LE: loop exit
PB: predicated region body
PF: predicated region fallthrough
CT: control target
= control target key end

     0   :  { %8 = vsyncpa [#allocation4], 0  ;;  %s835_s12 = smov 0   ;;  %s837_s13 = smov 0   ;;  %s903_s0 = inlined_call_operand.vmem [shape: bf16[1,128,27], index: 0, kind: input, shape index: {}]   ;;  %s904_s1 = inlined_call_operand.hbm [shape: bf16[1,27,128], index: 1, kind: input, shape index: {}]   ;;  %s905_s2 = inlined_call_operand.vmem [shape: f32[1,1,128], index: 2, kind: input, shape index: {}]   ;;  %s906_s3 = inlined_call_operand.vmem [shape: bf16[1,128,128], index: 3, kind: output, shape index: {}]  }
   0x1   :  { %s839_s14 = smov 0  }
   0x2 LB: > { %s627_s15 = sadd.s32 4294967295, %s809_s14   ;;  %s29_s16 = sadd.s32 1, %s805_s13  ;;  %s809_s14 = sphi %s839_s14, %s14_s14   ;;  %s805_s13 = sphi %s837_s13, %s910_s13   ;;  %s801_s12 = sphi %s835_s12, %s909_s12  }
   0x3   : > { %p31_p0 = scmp.ge.s32.totalorder %s29_s16, 2  ;;  %p629_p1 = scmp.ge.s32.totalorder %s809_s14, 1 }
   0x4   : > { %p148_p2 = scmp.lt.s32.totalorder %s809_s14, 3  ;;  %p860_p4 = scmp.eq.s32.totalorder %s627_s15, 0 }
   0x5   : > { %s912_s16 = smov (%p31_p0, %s29_s16), 0  ;;  %s811_s19 = smov [#allocation3]  }
   0x6   : > { %p856_p3 = pnand %p629_p1, %p148_p2  ;;  %s163_s20 = sshll.u32 %s811_s19, 4  ;;  %s164_s20 = int_to_ptr.vmem [resolvable:$true] %s163_s20 }
   0x7   : > { %s768_s21 = scalar_lea.vmem %s164_s20, 256  ;;  %p776_p11 = scmp.lt.s32.totalorder %s164_s20, %s164_s20 }
   0x8   : > { %p717_p5 = pneg %p856_p3  ;;  %p769_p8 = scmp.ne.s32.totalorder %s164_s20, %s768_s21 }
   0x9   : > { %p777_p12 = scmp.lt.s32.totalorder %s768_s21, %s768_s21 }
   0xa   : > { %p718_p6 = pnand %p860_p4, %p717_p5 }
   0xb   : > { %p778_p13 = por %p777_p12, %p776_p11 }
   0xc   : > { %p759_p7 = pneg %p718_p6 }
   0xe   : > { %p771_p9 = pnand %p769_p8, %p759_p7 }
  0x10   : > { %p772_p10 = pneg %p771_p9 }
  0x12   : > { %p779_p0 = pnand %p778_p13, %p772_p10 }
  0x14   : > { %782 = shalt.err (!%p779_p0)
}
  0x15   : > { %s812_s22 = smov 64   ;;  %s813_s23 = smov 4  }
  0x16   : > { %720 = dma.hbm_to_vmem [thread:$0]  (!%p718_p6), %s904_s1, 256, %s164_s20, [#allocation4], %s812_s22, %s812_s22, %s813_s23  }
  0x17   : > { %201 = sbr.rel (%p856_p3) target bundleno = 248 (0xf8), region = 32 }
  0x1c   : > { %796 = dma.done.wait (%p860_p4), [#allocation4], 256  }
  0x1d   : > { %798 = vsyncadd (%p860_p4), [#allocation4], 4294967040  ;;  %vm322_vm0 = vcmask 1044480   ;;  %s635_s26 = sshll.u32 %s801_s12, 3  ;;  %vm323_vm1 = vcmask 1045504   ;;  %v814_v0 = vmov 65535  }
  0x1e   : > { %p242_p1 = scmp.lt.s32.totalorder %s635_s26, 15  ;;  %v324_v1 = vsel %vm322_vm0, 4294967295, %v814_v0  ;;  %v751_v3 = vld [vmem:[#allocation3 + $0x8] sm:$0x3f]   ;;  %v752_v4 = vld [vmem:[#allocation3] sm:$0xff]   ;;  %vm309_vm2 = vcmask 220160  }
  0x1f   : > { %v325_v2 = vsel %vm323_vm1, %v324_v1, 0  ;;  %v649_v10 = vld [vmem:[%s905_s2] ss:$0 sm:$0xff] }
  0x20   : > { %s914_s26 = smov (!%p242_p1, %s635_s26), 15  ;;  %v327_v5 = vand.u32 %v751_v3, %v325_v2 }
  0x21   : > { %s636_s27 = sshll.u32 %s914_s26, 2 }
  0x22   : > { %s250_s30 = scalar_lea.vmem %s903_s0, %s636_s27  ;;  %697 = vmatprep.subr.bf16.mxu0 %v327_v5  ;;  %709 = vmatprep.subr.bf16.mxu1 %v327_v5  ;;  %s263_s8 = scalar_lea.vmem %s906_s3, %s636_s27 }
  0x23   : > { %v753_v6 = vld [vmem:[%s250_s30] sm:$0xff]   ;;  %v754_v7 = vld [vmem:[%s250_s30 + $0x10] sm:$0xff]   ;;  %698 = vmatpush3.bf16.msra.mxu0 %v327_v5  ;;  %711 = vmatpush3.bf16.msra.mxu1 %v327_v5  ;;  %v755_v8 = vld [vmem:[%s250_s30 + $0x8] sm:$0xff]  }
  0x24   : > { %699 = vmatprep.subr.bf16.mxu0 %v752_v4  ;;  %710 = vmatprep.subr.bf16.mxu1 %v752_v4  ;;  %v756_v9 = vld [vmem:[%s250_s30 + $0x18] sm:$0xff]  }
  0x25   : > { %701 = vmatprep.mubr.msk.bf16.mxu0 %vm309_vm2, %v753_v6  ;;  %705 = vmatprep.mubr.msk.bf16.mxu1 %vm309_vm2, %v754_v7 }
  0x27   : > { %700 = vmatpush3.bf16.msra.mxu0 %v752_v4  ;;  %712 = vmatpush3.bf16.msra.mxu1 %v752_v4 }
  0x2a   : > { %702 = vmatmul.mubr.msk.bf16.vlgmr.msra.gmra.mxu0 %vm309_vm2, %v755_v8  ;;  %706 = vmatmul.mubr.msk.bf16.vlgmr.msra.gmra.mxu1 %vm309_vm2, %v756_v9 }
  0xea   : > { %v703_v11 = vpop.f32.mrf.mxu0  ;;  %v707_v12 = vpop.f32.mrf.mxu1 }
  0xeb   : > { %v454_v13 = vadd.f32 %v703_v11, %v649_v10  ;;  %v458_v14 = vadd.f32 %v707_v12, %v649_v10 }
  0xec   : > { %v363_v15 = vpop.f32.mrf.mxu0  ;;  %v379_v16 = vpop.f32.mrf.mxu1 }
  0xed   : > { %v452_v17 = vadd.f32 %v649_v10, %v363_v15  ;;  %v456_v18 = vadd.f32 %v649_v10, %v379_v16  ;;  %v462_v23 = vmax.f32 %v454_v13, 0.0  ;;  %v466_v24 = vmax.f32 %v458_v14, 0.0 }
  0xee   : > { %v704_v19 = vpop.f32.mrf.mxu0  ;;  %v708_v20 = vpop.f32.mrf.mxu1 }
  0xef   : > { %v455_v21 = vadd.f32 %v704_v19, %v649_v10  ;;  %v459_v22 = vadd.f32 %v708_v20, %v649_v10  ;;  %v460_v31 = vmax.f32 %v452_v17, 0.0  ;;  %v464_v32 = vmax.f32 %v456_v18, 0.0 }
  0xf0   : > { %v366_v25 = vpop.f32.mrf.mxu0  ;;  %v382_v26 = vpop.f32.mrf.mxu1 }
  0xf1   : > { %v463_v27 = vmax.f32 %v455_v21, 0.0  ;;  %v467_v28 = vmax.f32 %v459_v22, 0.0  ;;  %v453_v29 = vadd.f32 %v649_v10, %v366_v25  ;;  %v457_v30 = vadd.f32 %v649_v10, %v382_v26 }
  0xf3   : > { %v676_v33 = vpack.c.bf16 %v463_v27, %v462_v23  ;;  %v686_v34 = vpack.c.bf16 %v467_v28, %v466_v24  ;;  %v461_v35 = vmax.f32 %v453_v29, 0.0  ;;  %v465_v36 = vmax.f32 %v457_v30, 0.0 }
  0xf5   : > { %688 = vst [vmem:[%s263_s8 + $0x8] sm:$0xff] %v676_v33   ;;  %690 = vst [vmem:[%s263_s8 + $0x18] sm:$0xff] %v686_v34   ;;  %v671_v37 = vpack.c.bf16 %v461_v35, %v460_v31  ;;  %v681_v38 = vpack.c.bf16 %v465_v36, %v464_v32 }
  0xf7   : > { %672 = vst [vmem:[%s263_s8] sm:$0xff] %v671_v37   ;;  %689 = vst [vmem:[%s263_s8 + $0x10] sm:$0xff] %v681_v38  }
  0xf8 PF: > { %s14_s14 = sadd.s32 1, %s809_s14   ;;  %s909_s12 = smov %s805_s13 }
  0xf9   : > { %p11_p2 = scmp.ge.s32.totalorder %s14_s14, 4   ;;  %s910_s13 = smov %s912_s16 }
  0xfb   :  { %13 = sbr.rel (!%p11_p2) target bundleno = 2 (0x2), region = 83 }
 0x100   :  { %538 = vsyncpa [#allocation4], 1 }
 0x101   :  { %540 = vsyncpa [#allocation4 + $0x1], 1 }

// kernel: net_forward.6
= control target key start
LH: loop header
LB: loop body
LE: loop exit
PB: predicated region body
PF: predicated region fallthrough
CT: control target
= control target key end

     0   :  { %8 = vsyncpa [#allocation4], 0  ;;  %s844_s12 = smov 0   ;;  %s846_s13 = smov 0   ;;  %s916_s0 = inlined_call_operand.vmem [shape: bf16[1,128,36], index: 0, kind: input, shape index: {}]   ;;  %s917_s1 = inlined_call_operand.hbm [shape: bf16[1,36,128], index: 1, kind: input, shape index: {}]   ;;  %s918_s2 = inlined_call_operand.vmem [shape: f32[1,1,128], index: 2, kind: input, shape index: {}]   ;;  %s919_s3 = inlined_call_operand.vmem [shape: bf16[1,128,128], index: 3, kind: output, shape index: {}]  }
   0x1   :  { %s848_s14 = smov 0  }
   0x2 LB: > { %s629_s15 = sadd.s32 4294967295, %s819_s14   ;;  %s29_s16 = sadd.s32 1, %s815_s13  ;;  %s819_s14 = sphi %s848_s14, %s14_s14   ;;  %s815_s13 = sphi %s846_s13, %s923_s13   ;;  %s811_s12 = sphi %s844_s12, %s922_s12  }
   0x3   : > { %p31_p0 = scmp.ge.s32.totalorder %s29_s16, 2  ;;  %p631_p1 = scmp.ge.s32.totalorder %s819_s14, 1 }
   0x4   : > { %p148_p2 = scmp.lt.s32.totalorder %s819_s14, 3  ;;  %p869_p4 = scmp.eq.s32.totalorder %s629_s15, 0 }
   0x5   : > { %s925_s16 = smov (%p31_p0, %s29_s16), 0  ;;  %s821_s19 = smov [#allocation3]  }
   0x6   : > { %p865_p3 = pnand %p631_p1, %p148_p2  ;;  %s163_s20 = sshll.u32 %s821_s19, 4  ;;  %s164_s20 = int_to_ptr.vmem [resolvable:$true] %s163_s20 }
   0x7   : > { %s778_s21 = scalar_lea.vmem %s164_s20, 320  ;;  %p786_p11 = scmp.lt.s32.totalorder %s164_s20, %s164_s20 }
   0x8   : > { %p727_p5 = pneg %p865_p3  ;;  %p779_p8 = scmp.ne.s32.totalorder %s164_s20, %s778_s21 }
   0x9   : > { %p787_p12 = scmp.lt.s32.totalorder %s778_s21, %s778_s21 }
   0xa   : > { %p728_p6 = pnand %p869_p4, %p727_p5 }
   0xb   : > { %p788_p13 = por %p787_p12, %p786_p11 }
   0xc   : > { %p769_p7 = pneg %p728_p6 }
   0xe   : > { %p781_p9 = pnand %p779_p8, %p769_p7 }
  0x10   : > { %p782_p10 = pneg %p781_p9 }
  0x12   : > { %p789_p0 = pnand %p788_p13, %p782_p10 }
  0x14   : > { %792 = shalt.err (!%p789_p0)
}
  0x15   : > { %s822_s22 = smov 64   ;;  %s823_s23 = smov 4  }
  0x16   : > { %730 = dma.hbm_to_vmem [thread:$0]  (!%p728_p6), %s917_s1, 320, %s164_s20, [#allocation4], %s822_s22, %s822_s22, %s823_s23  }
  0x17   : > { %201 = sbr.rel (%p865_p3) target bundleno = 250 (0xfa), region = 32 }
  0x1c   : > { %806 = dma.done.wait (%p869_p4), [#allocation4], 320  }
  0x1d   : > { %808 = vsyncadd (%p869_p4), [#allocation4], 4294966976  ;;  %s637_s26 = sshll.u32 %s811_s12, 3  ;;  %vm327_vm0 = vcmask 1041408   ;;  %vm314_vm1 = vcmask 293888   ;;  %v761_v1 = vld [vmem:[#allocation3 + $0x8] sm:$0xff]  }
  0x1e   : > { %p242_p1 = scmp.lt.s32.totalorder %s637_s26, 15  ;;  %v760_v0 = vld [vmem:[#allocation3 + $0x10] ss:$0 sps:$4 sm:$0x33]   ;;  %v762_v3 = vld [vmem:[#allocation3] sm:$0xff]  }
  0x1f   : > { %721 = vmatprep.subr.msk.bf16.mxu0 %vm327_vm0, %v760_v0  ;;  %722 = vmatprep.subr.msk.bf16.mxu1 %vm327_vm0, %v760_v0  ;;  %v329_v2 = vsel %vm327_vm0, %v760_v0, 0  ;;  %v652_v8 = vld [vmem:[%s918_s2] ss:$0 sm:$0xff] }
  0x20   : > { %s927_s26 = smov (!%p242_p1, %s637_s26), 15  ;;  %702 = vmatpush3.bf16.msra.mxu0 %v329_v2  ;;  %718 = vmatpush3.bf16.msra.mxu1 %v329_v2 }
  0x21   : > { %s638_s27 = sshll.u32 %s927_s26, 2  ;;  %703 = vmatprep.subr.bf16.mxu0 %v761_v1  ;;  %716 = vmatprep.subr.bf16.mxu1 %v761_v1 }
  0x22   : > { %s250_s30 = scalar_lea.vmem %s916_s0, %s638_s27  ;;  %s263_s8 = scalar_lea.vmem %s919_s3, %s638_s27 }
  0x23   : > { %v763_v4 = vld [vmem:[%s250_s30] sm:$0xff]   ;;  %v764_v5 = vld [vmem:[%s250_s30 + $0x10] sm:$0xff]   ;;  %v765_v6 = vld [vmem:[%s250_s30 + $0x8] sm:$0xff]  }
  0x24   : > { %707 = vmatprep.mubr.msk.bf16.mxu0 %vm314_vm1, %v763_v4  ;;  %711 = vmatprep.mubr.msk.bf16.mxu1 %vm314_vm1, %v764_v5  ;;  %v766_v7 = vld [vmem:[%s250_s30 + $0x18] sm:$0xff]  }
  0x25   : > { %704 = vmatpush3.bf16.msra.mxu0 %v761_v1  ;;  %719 = vmatpush3.bf16.msra.mxu1 %v761_v1 }
  0x26   : > { %705 = vmatprep.subr.bf16.mxu0 %v762_v3  ;;  %717 = vmatprep.subr.bf16.mxu1 %v762_v3 }
  0x29   : > { %706 = vmatpush3.bf16.msra.mxu0 %v762_v3  ;;  %720 = vmatpush3.bf16.msra.mxu1 %v762_v3 }
  0x2c   : > { %708 = vmatmul.mubr.msk.bf16.vlgmr.msra.gmra.mxu0 %vm314_vm1, %v765_v6  ;;  %712 = vmatmul.mubr.msk.bf16.vlgmr.msra.gmra.mxu1 %vm314_vm1, %v766_v7 }
  0xec   : > { %v709_v9 = vpop.f32.mrf.mxu0  ;;  %v713_v10 = vpop.f32.mrf.mxu1 }
  0xed   : > { %v456_v11 = vadd.f32 %v709_v9, %v652_v8  ;;  %v460_v12 = vadd.f32 %v713_v10, %v652_v8 }
  0xee   : > { %v365_v13 = vpop.f32.mrf.mxu0  ;;  %v381_v14 = vpop.f32.mrf.mxu1 }
  0xef   : > { %v454_v15 = vadd.f32 %v652_v8, %v365_v13  ;;  %v458_v16 = vadd.f32 %v652_v8, %v381_v14  ;;  %v464_v21 = vmax.f32 %v456_v11, 0.0  ;;  %v468_v22 = vmax.f32 %v460_v12, 0.0 }
  0xf0   : > { %v710_v17 = vpop.f32.mrf.mxu0  ;;  %v714_v18 = vpop.f32.mrf.mxu1 }
  0xf1   : > { %v457_v19 = vadd.f32 %v710_v17, %v652_v8  ;;  %v461_v20 = vadd.f32 %v714_v18, %v652_v8  ;;  %v462_v29 = vmax.f32 %v454_v15, 0.0  ;;  %v466_v30 = vmax.f32 %v458_v16, 0.0 }
  0xf2   : > { %v368_v23 = vpop.f32.mrf.mxu0  ;;  %v384_v24 = vpop.f32.mrf.mxu1 }
  0xf3   : > { %v465_v25 = vmax.f32 %v457_v19, 0.0  ;;  %v469_v26 = vmax.f32 %v461_v20, 0.0  ;;  %v455_v27 = vadd.f32 %v652_v8, %v368_v23  ;;  %v459_v28 = vadd.f32 %v652_v8, %v384_v24 }
  0xf5   : > { %v679_v31 = vpack.c.bf16 %v465_v25, %v464_v21  ;;  %v689_v32 = vpack.c.bf16 %v469_v26, %v468_v22  ;;  %v463_v33 = vmax.f32 %v455_v27, 0.0  ;;  %v467_v34 = vmax.f32 %v459_v28, 0.0 }
  0xf7   : > { %691 = vst [vmem:[%s263_s8 + $0x8] sm:$0xff] %v679_v31   ;;  %693 = vst [vmem:[%s263_s8 + $0x18] sm:$0xff] %v689_v32   ;;  %v674_v35 = vpack.c.bf16 %v463_v33, %v462_v29  ;;  %v684_v36 = vpack.c.bf16 %v467_v34, %v466_v30 }
  0xf9   : > { %675 = vst [vmem:[%s263_s8] sm:$0xff] %v674_v35   ;;  %692 = vst [vmem:[%s263_s8 + $0x10] sm:$0xff] %v684_v36  }
  0xfa PF: > { %s14_s14 = sadd.s32 1, %s819_s14   ;;  %s922_s12 = smov %s815_s13 }
  0xfb   : > { %p11_p2 = scmp.ge.s32.totalorder %s14_s14, 4   ;;  %s923_s13 = smov %s925_s16 }
  0xfd   :  { %13 = sbr.rel (!%p11_p2) target bundleno = 2 (0x2), region = 83 }
 0x102   :  { %540 = vsyncpa [#allocation4], 1 }
 0x103   :  { %542 = vsyncpa [#allocation4 + $0x1], 1 }

// kernel: net_forward.7
= control target key start
LH: loop header
LB: loop body
LE: loop exit
PB: predicated region body
PF: predicated region fallthrough
CT: control target
= control target key end

     0   :  { %s1629_s0 = inlined_call_operand.vmem [shape: bf16[2,32,1152], index: 0, kind: input, shape index: {}]   ;;  %s1630_s1 = inlined_call_operand.hbm [shape: bf16[2,1152,256], index: 1, kind: input, shape index: {}]   ;;  %s1631_s2 = inlined_call_operand.vmem [shape: f32[2,1,256], index: 2, kind: input, shape index: {}]   ;;  %s1632_s3 = inlined_call_operand.vmem [shape: bf16[2,32,256], index: 3, kind: output, shape index: {}]  }
   0x1   :  { %1633 = sst [smem:[#allocation7_spill]] %s1629_s0 }
   0x2   :  { %8 = vsyncpa [#allocation5], 0 }
   0x3   :  { %10 = vsyncpa [#allocation5 + $0x1], 0  ;;  %s1403_s12 = smov 0   ;;  %s1405_s13 = smov 0  }
   0x4   :  { %s1407_s14 = smov 0   ;;  %s1409_s15 = smov 0  }
   0x5   :  { %s1411_s16 = smov 0   ;;  %s1413_s17 = smov 0  }
   0x6   :  { %s1415_s18 = smov 0   ;;  %s1417_s19 = smov 0  }
   0x7   :  { %s1419_s20 = smov 0   ;;  %s1421_s21 = smov 0  }
   0x8 LB: > { %s1009_s22 = sadd.s32 4294967295, %s1377_s21   ;;  %s28_s23 = sadd.s32 1, %s1369_s19  ;;  %s1377_s21 = sphi %s1421_s21, %s16_s21   ;;  %s1373_s20 = sphi %s1419_s20, %s1646_s20   ;;  %s1369_s19 = sphi %s1417_s19, %s1645_s19   ;;  %s1365_s18 = sphi %s1415_s18, %s1644_s18   ;;  %s1361_s17 = sphi %s1413_s17, %s1643_s17   ;;  %s1357_s16 = sphi %s1411_s16, %s1642_s16   ;;  %s1353_s15 = sphi %s1409_s15, %s1641_s15   ;;  %s1349_s14 = sphi %s1407_s14, %s1640_s14   ;;  %s1345_s13 = sphi %s1405_s13, %s1639_s13   ;;  %s1341_s12 = sphi %s1403_s12, %s1638_s12  }
   0x9   : > { %p29_p0 = scmp.ge.s32.totalorder %s28_s23, 3  ;;  %s35_s24 = sadd.s32 1, %s1373_s20 }
   0xa   : > { %s46_s25 = sadd.s32 1, %s1357_s16  ;;  %p53_p1 = scmp.ne.s32.totalorder %s1357_s16, %s1353_s15 }
   0xb   : > { %s1648_s23 = smov (%p29_p0, %s28_s23), 0  ;;  %s1650_s24 = smov (!%p29_p0, %s35_s24), %s1373_s20 }
   0xc   : > { %s42_s26 = ssub.s32 %s1369_s19, %s1648_s23  ;;  %p54_p2 = scmp.eq.s32.totalorder %s1377_s21, 0 }
   0xd   : > { %p37_p3 = scmp.ge.s32.totalorder %s1650_s24, 2  ;;  %s72_s27 = sadd.s32 1, %s1349_s14 }
   0xe   : > { %p1466_p4 = por %p54_p2, %p53_p1  ;;  %p79_p5 = scmp.ne.s32.totalorder %s1349_s14, %s1345_s13 }
   0xf   : > { %s1652_s24 = smov (%p37_p3, %s1650_s24), 0  ;;  %p85_p7 = scmp.ne.s32.totalorder %s1345_s13, %s1341_s12 }
  0x10   : > { %p1474_p6 = por %p79_p5, %p54_p2  ;;  %s39_s30 = ssub.s32 %s1373_s20, %s1652_s24 }
  0x11   : > { %p86_p8 = scmp.eq.s32.totalorder %s1009_s22, 0  ;;  %s43_s4 = sor.u32 %s42_s26, %s39_s30 }
  0x12   : > { %p70_p9 = scmp.eq.s32.totalorder %s39_s30, 0  ;;  %p44_p10 = scmp.eq.s32.totalorder %s43_s4, 0 }
  0x13   : > { %p1482_p11 = por %p86_p8, %p85_p7  ;;  %p1012_p12 = scmp.ge.s32.totalorder %s1377_s21, 6 }
  0x14   : > { %s1487_s6 = scalar_select %p70_p9, %s1349_s14, %s72_s27  }
  0x15   : > { %s1490_s7 = scalar_select %p44_p10, %s1357_s16, %s46_s25  }
  0x16   : > { %159 = sbr.rel (%p1012_p12) target bundleno = 57 (0x39), region = 16 }
  0x1b   : > { %162 = sbr.rel (!%p1466_p4) target bundleno = 40 (0x28), region = 20  ;;  %s164_s8 = sand.u32 (%p1466_p4), 1, %s1357_s16  }
  0x1c   : > { %s168_s9 = smul.u32 (%p1466_p4), 3, %s1369_s19  ;;  %s1637_s0 = sld [smem:[#allocation7_spill]] (%p1466_p4) }
  0x1d   : > { %s1098_s10 = smul.u32 (%p1466_p4), 48, %s164_s8 }
  0x1e   : > { %s1099_s11 = smul.u32 (%p1466_p4), 36, %s1373_s20 }
  0x1f   : > { %s166_s30 = scalar_lea.vmem (%p1466_p4), [#allocation3], %s1098_s10 }
  0x20   : > { %s172_s12 = sadd.s32 %s1099_s11, %s168_s9 }
  0x21   : > { %s1013_s22 = sshll.u32 %s172_s12, 2 }
  0x22   : > { %s174_s25 = scalar_lea.vmem %s1637_s0, %s1013_s22 }
  0x23   : > { %v189_v0 = vld [vmem:[%s174_s25] sm:$0xff]  ;;  %v193_v2 = vld [vmem:[%s174_s25 + $0x48] sm:$0xff]  ;;  %v1018_v6 = vld [vmem:[%s174_s25 + $0x50] sm:$0xf] }
  0x24   : > { %v191_v1 = vld [vmem:[%s174_s25 + $0x24] sm:$0xff]  ;;  %190 = vst [vmem:[%s166_s30] sm:$0xff] %v189_v0  ;;  %194 = vst [vmem:[%s166_s30 + $0x18] sm:$0xff] %v193_v2  ;;  %v195_v3 = vld [vmem:[%s174_s25 + $0x6c] sm:$0xff] }
  0x25   : > { %192 = vst [vmem:[%s166_s30 + $0xc] sm:$0xff] %v191_v1  ;;  %v1014_v4 = vld [vmem:[%s174_s25 + $0x8] sm:$0xf]  ;;  %v1016_v5 = vld [vmem:[%s174_s25 + $0x2c] sm:$0xf]  ;;  %196 = vst [vmem:[%s166_s30 + $0x24] sm:$0xff] %v195_v3 }
  0x26   : > { %1015 = vst [vmem:[%s166_s30 + $0x8] sm:$0xf] %v1014_v4  ;;  %1017 = vst [vmem:[%s166_s30 + $0x14] sm:$0xf] %v1016_v5  ;;  %v1020_v7 = vld [vmem:[%s174_s25 + $0x74] sm:$0xf] }
  0x27   : > { %1019 = vst [vmem:[%s166_s30 + $0x20] sm:$0xf] %v1018_v6  ;;  %1021 = vst [vmem:[%s166_s30 + $0x2c] sm:$0xf] %v1020_v7 }
  0x28 PF: > { %s219_s28 = sand.u32 1, %s1349_s14   ;;  %s1101_s4 = smul.u32 18432, %s1373_s20 }
  0x29   : > { %s1100_s8 = smul.u32 1152, %s219_s28  ;;  %s220_s26 = scalar_lea.sflag [#allocation5], %s219_s28 }
  0x2a   : > { %s229_s11 = scalar_lea.hbm %s1630_s1, %s1101_s4  ;;  %s1379_s25 = smov [#allocation4]  }
  0x2b   : > { %s223_s12 = scalar_lea.vmem [#allocation4], %s1100_s8  ;;  %s1285_s30 = sshll.u32 %s1379_s25, 4  ;;  %s1286_s30 = int_to_ptr.vmem [resolvable:$false] %s1285_s30 }
  0x2c   : > { %s230_s22 = sshll.u32 %s223_s12, 4  ;;  %s1287_s0 = scalar_lea.vmem %s1286_s30, 36864  ;;  %s231_s22 = int_to_ptr.vmem [resolvable:$true] %s230_s22 }
  0x2d   : > { %s1281_s27 = scalar_lea.vmem %s231_s22, 18432  ;;  %p1288_p2 = scmp.lt.s32.totalorder %s231_s22, %s1286_s30 }
  0x2e   : > { %p1282_p13 = scmp.ne.s32.totalorder %s231_s22, %s1281_s27  ;;  %p1289_p3 = scmp.lt.s32.totalorder %s1287_s0, %s1281_s27 }
  0x30   : > { %p1283_p0 = pnand %p1282_p13, %p1474_p6  ;;  %p1290_p4 = por %p1289_p3, %p1288_p2 }
  0x32   : > { %p1284_p1 = pneg %p1283_p0 }
  0x34   : > { %p1291_p5 = pnand %p1290_p4, %p1284_p1 }
  0x36   : > { %1294 = shalt.err (!%p1291_p5)
}
  0x37   : > { %s1380_s9 = smov 128   ;;  %s1381_s4 = smov 8  }
  0x38   : > { %1104 = dma.hbm_to_vmem [thread:$0]  (%p1474_p6), %s229_s11, 18432, %s231_s22, %s220_s26, %s1380_s9, %s1380_s9, %s1381_s4  }
  0x39 PF: > { %p1023_p7 = scmp.ge.s32.totalorder %s1377_s21, 1  ;;  %p245_p8 = scmp.lt.s32.totalorder %s1377_s21, 7 }
  0x3b   : > { %p246_p9 = pnand %p1023_p7, %p245_p8 }
  0x3c   : > { %s252_s28 = sand.u32 (!%p246_p9), 1, %s1353_s15   ;;  %s258_s0 = sand.u32 (!%p246_p9), 1, %s1345_s13  }
  0x3d   : > { %249 = sbr.rel (%p246_p9) target bundleno = 388 (0x184), region = 54  ;;  %s259_s27 = scalar_lea.sflag (!%p246_p9), [#allocation5], %s258_s0 }
  0x3e   : > { %s1102_s8 = smul.u32 (!%p246_p9), 48, %s252_s28 }
  0x3f   : > { %s1103_s10 = smul.u32 (!%p246_p9), 1152, %s258_s0 }
  0x40   : > { %s1514_s12 = scalar_lea.vmem (!%p246_p9), [#allocation3], %s1102_s8 }
  0x41   : > { %s262_s25 = scalar_lea.vmem (!%p246_p9), [#allocation4], %s1103_s10 }
  0x42   : > { %1336 = dma.done.wait (%p1482_p11), %s259_s27, 18432  }
  0x43   : > { %1338 = vsyncadd (%p1482_p11), %s259_s27, 4294948864  ;;  %p300_p6 = scmp.lt.s32.totalorder %s1365_s18, 1  ;;  %s316_s29 = smul.u32 384, %s1361_s17  ;;  %v1382_v8 = vmov 0   ;;  %v1264_v42 = vld [vmem:[%s1514_s12 + $0x4] ss:$12 sps:$4 sm:$0xff]  }
  0x44   : > { %735 = vmatprep.mubr.bf16.mxu1 %v1382_v8  ;;  %682 = vmatprep.mubr.bf16.mxu0 %v1264_v42  ;;  %v1258_v49 = vld [vmem:[%s1514_s12 + $0x8] ss:$12 sps:$4 sm:$0xff]   ;;  %v1265_v54 = vld [vmem:[%s1514_s12 + $0x20] ss:$12 sps:$4 sm:$0xff]   ;;  %v1268_v62 = vld [vmem:[%s1514_s12 + $0x18] ss:$12 sps:$4 sm:$0xff]  }
  0x45   : > { %s1654_s18 = smov (!%p300_p6, %s1365_s18), 1  ;;  %s317_s15 = sshra.s32 %s316_s29, 3  ;;  %v1262_v60 = vld [vmem:[%s1514_s12] ss:$12 sps:$4 sm:$0xff]   ;;  %v1266_v61 = vld [vmem:[%s1514_s12 + $0x1c] ss:$12 sps:$4 sm:$0xff]  }
  0x46   : > { %s1024_s11 = sshll.u32 %s1654_s18, 1  ;;  %s1092_s22 = sshll.u32 %s1654_s18, 5 }
  0x47   : > { %s1527_s9 = scalar_lea.vmem %s1631_s2, %s1024_s11  ;;  %s1532_s28 = scalar_lea.vmem %s1632_s3, %s1092_s22 }
  0x48   : > { %s1093_s0 = sshll.u32 %s317_s15, 3  ;;  %p1083_p10 = scmp.ne.s32.totalorder %s1361_s17, 0 }
  0x49   : > { %s1534_s8 = scalar_lea.vmem %s262_s25, %s1093_s0 [#allocation4] }
  0x4a   : > { %v1189_v9 = vld [vmem:[%s1534_s8 + $0x74] ss:$8 sps:$4 sm:$0xff]   ;;  %v1191_v10 = vld [vmem:[%s1534_s8 + $0x70] ss:$8 sps:$4 sm:$0xff]   ;;  %v1192_v11 = vld [vmem:[%s1534_s8 + $0x64] ss:$8 sps:$4 sm:$0xff]  }
  0x4b   : > { %650 = vmatprep.subr.bf16.mxu0 %v1189_v9  ;;  %v1194_v12 = vld [vmem:[%s1534_s8 + $0x60] ss:$8 sps:$4 sm:$0xff]   ;;  %v1195_v13 = vld [vmem:[%s1534_s8 + $0x54] ss:$8 sps:$4 sm:$0xff]   ;;  %v1197_v14 = vld [vmem:[%s1534_s8 + $0x50] ss:$8 sps:$4 sm:$0xff]  }
  0x4c   : > { %651 = vmatpush1.bf16.msra.mxu0 %v1191_v10  ;;  %v1198_v15 = vld [vmem:[%s1534_s8 + $0x44] ss:$8 sps:$4 sm:$0xff]   ;;  %v1210_v16 = vld [vmem:[%s1534_s8 + $0x174] ss:$8 sps:$4 sm:$0xff]   ;;  %v1212_v17 = vld [vmem:[%s1534_s8 + $0x170] ss:$8 sps:$4 sm:$0xff]  }
  0x4d   : > { %652 = vmatprep.subr.bf16.mxu0 %v1192_v11  ;;  %v1200_v18 = vld [vmem:[%s1534_s8 + $0x40] ss:$8 sps:$4 sm:$0xff]   ;;  %v1201_v19 = vld [vmem:[%s1534_s8 + $0x34] ss:$8 sps:$4 sm:$0xff]   ;;  %703 = vmatprep.subr.bf16.mxu1 %v1210_v16  ;;  %v1216_v20 = vld [vmem:[%s1534_s8 + $0x164] ss:$8 sps:$4 sm:$0xff]  }
  0x4e   : > { %704 = vmatpush1.bf16.msra.mxu1 %v1212_v17  ;;  %v1218_v21 = vld [vmem:[%s1534_s8 + $0x160] ss:$8 sps:$4 sm:$0xff]   ;;  %v1203_v22 = vld [vmem:[%s1534_s8 + $0x30] ss:$8 sps:$4 sm:$0xff]   ;;  %v1222_v23 = vld [vmem:[%s1534_s8 + $0x154] ss:$8 sps:$4 sm:$0xff]  }
  0x4f   : > { %705 = vmatprep.subr.bf16.mxu1 %v1216_v20  ;;  %v1204_v24 = vld [vmem:[%s1534_s8 + $0x24] ss:$8 sps:$4 sm:$0xff]   ;;  %v1224_v25 = vld [vmem:[%s1534_s8 + $0x150] ss:$8 sps:$4 sm:$0xff]   ;;  %v1206_v27 = vld [vmem:[%s1534_s8 + $0x20] ss:$8 sps:$4 sm:$0xff]  }
  0x50   : > { %653 = vmatpush1.bf16.msra.mxu0 %v1194_v12  ;;  %v1228_v26 = vld [vmem:[%s1534_s8 + $0x144] ss:$8 sps:$4 sm:$0xff]   ;;  %v1207_v28 = vld [vmem:[%s1534_s8 + $0x14] ss:$8 sps:$4 sm:$0xff]   ;;  %v1230_v29 = vld [vmem:[%s1534_s8 + $0x140] ss:$8 sps:$4 sm:$0xff]  }
  0x51   : > { %654 = vmatprep.subr.bf16.mxu0 %v1195_v13  ;;  %v1234_v30 = vld [vmem:[%s1534_s8 + $0x134] ss:$8 sps:$4 sm:$0xff]   ;;  %v1209_v31 = vld [vmem:[%s1534_s8 + $0x10] ss:$8 sps:$4 sm:$0xff]   ;;  %v1213_v32 = vld [vmem:[%s1534_s8 + $0x4] ss:$8 sps:$4 sm:$0xff]  }
  0x52   : > { %706 = vmatpush1.bf16.msra.mxu1 %v1218_v21  ;;  %v1236_v33 = vld [vmem:[%s1534_s8 + $0x130] ss:$8 sps:$4 sm:$0xff]   ;;  %v1240_v34 = vld [vmem:[%s1534_s8 + $0x124] ss:$8 sps:$4 sm:$0xff]   ;;  %v1215_v35 = vld [vmem:[%s1534_s8] ss:$8 sps:$4 sm:$0xff]  }
  0x53   : > { %707 = vmatprep.subr.bf16.mxu1 %v1222_v23  ;;  %v1219_v36 = vld [vmem:[%s1534_s8 + $0xf4] ss:$8 sps:$4 sm:$0xff]   ;;  %v1242_v37 = vld [vmem:[%s1534_s8 + $0x120] ss:$8 sps:$4 sm:$0xff]   ;;  %v1221_v39 = vld [vmem:[%s1534_s8 + $0xf0] ss:$8 sps:$4 sm:$0xff]  }
  0x54   : > { %655 = vmatpush1.bf16.msra.mxu0 %v1197_v14  ;;  %v1246_v38 = vld [vmem:[%s1534_s8 + $0x114] ss:$8 sps:$4 sm:$0xff]   ;;  %v1225_v40 = vld [vmem:[%s1534_s8 + $0xe4] ss:$8 sps:$4 sm:$0xff]   ;;  %v1248_v41 = vld [vmem:[%s1534_s8 + $0x110] ss:$8 sps:$4 sm:$0xff]  }
  0x55   : > { %656 = vmatprep.subr.bf16.mxu0 %v1198_v15  ;;  %v1252_v43 = vld [vmem:[%s1534_s8 + $0x104] ss:$8 sps:$4 sm:$0xff]   ;;  %v1227_v44 = vld [vmem:[%s1534_s8 + $0xe0] ss:$8 sps:$4 sm:$0xff]   ;;  %v1231_v45 = vld [vmem:[%s1534_s8 + $0xd4] ss:$8 sps:$4 sm:$0xff]  }
  0x56   : > { %708 = vmatpush1.bf16.msra.mxu1 %v1224_v25  ;;  %v1254_v46 = vld [vmem:[%s1534_s8 + $0x100] ss:$8 sps:$4 sm:$0xff]   ;;  %v1233_v47 = vld [vmem:[%s1534_s8 + $0xd0] ss:$8 sps:$4 sm:$0xff]   ;;  %v1237_v48 = vld [vmem:[%s1534_s8 + $0xc4] ss:$8 sps:$4 sm:$0xff]  }
  0x57   : > { %709 = vmatprep.subr.bf16.mxu1 %v1228_v26  ;;  %v1239_v50 = vld [vmem:[%s1534_s8 + $0xc0] ss:$8 sps:$4 sm:$0xff]   ;;  %v1243_v51 = vld [vmem:[%s1534_s8 + $0xb4] ss:$8 sps:$4 sm:$0xff]   ;;  %v1245_v52 = vld [vmem:[%s1534_s8 + $0xb0] ss:$8 sps:$4 sm:$0xff]  }
  0x58   : > { %657 = vmatpush1.bf16.msra.mxu0 %v1200_v18  ;;  %v1249_v53 = vld [vmem:[%s1534_s8 + $0xa4] ss:$8 sps:$4 sm:$0xff]   ;;  %v1251_v55 = vld [vmem:[%s1534_s8 + $0xa0] ss:$8 sps:$4 sm:$0xff]   ;;  %v1255_v56 = vld [vmem:[%s1534_s8 + $0x94] ss:$8 sps:$4 sm:$0xff]  }
  0x59   : > { %658 = vmatprep.subr.bf16.mxu0 %v1201_v19  ;;  %v1257_v57 = vld [vmem:[%s1534_s8 + $0x90] ss:$8 sps:$4 sm:$0xff]   ;;  %v1259_v58 = vld [vmem:[%s1534_s8 + $0x84] ss:$8 sps:$4 sm:$0xff]   ;;  %v1261_v59 = vld [vmem:[%s1534_s8 + $0x80] ss:$8 sps:$4 sm:$0xff]  }
  0x5a   : > { %710 = vmatpush1.bf16.msra.mxu1 %v1230_v29 }
  0x5b   : > { %711 = vmatprep.subr.bf16.mxu1 %v1234_v30 }
  0x5c   : > { %659 = vmatpush1.bf16.msra.mxu0 %v1203_v22 }
  0x5d   : > { %660 = vmatprep.subr.bf16.mxu0 %v1204_v24 }
  0x5e   : > { %712 = vmatpush1.bf16.msra.mxu1 %v1236_v33 }
  0x5f   : > { %713 = vmatprep.subr.bf16.mxu1 %v1240_v34 }
  0x60   : > { %661 = vmatpush1.bf16.msra.mxu0 %v1206_v27 }
  0x61   : > { %662 = vmatprep.subr.bf16.mxu0 %v1207_v28 }
  0x62   : > { %714 = vmatpush1.bf16.msra.mxu1 %v1242_v37 }
  0x63   : > { %715 = vmatprep.subr.bf16.mxu1 %v1246_v38 }
  0x64   : > { %663 = vmatpush1.bf16.msra.mxu0 %v1209_v31 }
  0x65   : > { %664 = vmatprep.subr.bf16.mxu0 %v1213_v32 }
  0x66   : > { %716 = vmatpush1.bf16.msra.mxu1 %v1248_v41 }
  0x67   : > { %717 = vmatprep.subr.bf16.mxu1 %v1252_v43 }
  0x68   : > { %665 = vmatpush1.bf16.msra.mxu0 %v1215_v35 }
  0x69   : > { %666 = vmatprep.subr.bf16.mxu0 %v1219_v36 }
  0x6a   : > { %718 = vmatpush1.bf16.msra.mxu1 %v1254_v46 }
  0x6c   : > { %667 = vmatpush2.bf16.msra.mxu0 %v1221_v39 }
  0x6d   : > { %668 = vmatprep.subr.bf16.mxu0 %v1225_v40  ;;  %736 = vmatmul.mubr.bf16.vlgmr.msra.gmra.mxu1 %v1258_v49 }
  0x6e   : > { %745 = vmatprep.mubr.bf16.mxu1 %v1382_v8 }
  0x70   : > { %669 = vmatpush2.bf16.msra.mxu0 %v1227_v44 }
  0x71   : > { %670 = vmatprep.subr.bf16.mxu0 %v1231_v45 }
  0x74   : > { %671 = vmatpush2.bf16.msra.mxu0 %v1233_v47 }
  0x75   : > { %672 = vmatprep.subr.bf16.mxu0 %v1237_v48  ;;  %746 = vmatmul.mubr.bf16.gmra.mxu1 %v1265_v54 }
  0x78   : > { %673 = vmatpush2.bf16.msra.mxu0 %v1239_v50 }
  0x79   : > { %674 = vmatprep.subr.bf16.mxu0 %v1243_v51 }
  0x7c   : > { %675 = vmatpush2.bf16.msra.mxu0 %v1245_v52 }
  0x7d   : > { %676 = vmatprep.subr.bf16.mxu0 %v1249_v53 }
  0x80   : > { %677 = vmatpush2.bf16.msra.mxu0 %v1251_v55 }
  0x81   : > { %678 = vmatprep.subr.bf16.mxu0 %v1255_v56 }
  0x84   : > { %679 = vmatpush2.bf16.msra.mxu0 %v1257_v57 }
  0x85   : > { %680 = vmatprep.subr.bf16.mxu0 %v1259_v58 }
  0x88   : > { %681 = vmatpush2.bf16.msra.mxu0 %v1261_v59 }
  0x8b   : > { %683 = vmatmul.mubr.bf16.vlgmr.msra.gmra.mxu0 %v1262_v60 }
  0x8c   : > { %692 = vmatprep.mubr.bf16.mxu0 %v1266_v61 }
  0x93   : > { %693 = vmatmul.mubr.bf16.gmra.mxu0 %v1268_v62 }
 0x12d   : > { %v737_v63 = vpop.f32.mrf.mxu1 }
 0x12f   : > { %v739_v0 = vpop.f32.mrf.mxu1 }
 0x131   : > { %v741_v1 = vpop.f32.mrf.mxu1 }
 0x133   : > { %v743_v2 = vpop.f32.mrf.mxu1 }
 0x135   : > { %v747_v6 = vpop.f32.mrf.mxu1 }
 0x137   : > { %v749_v10 = vpop.f32.mrf.mxu1 }
 0x139   : > { %v751_v15 = vpop.f32.mrf.mxu1 }
 0x13b   : > { %v753_v20 = vpop.f32.mrf.mxu1 }
 0x14b   : > { %v684_v3 = vpop.f32.mrf.mxu0 }
 0x14c   : > { %v738_v4 = vadd.f32 %v737_v63, %v684_v3 }
 0x14d   : > { %v686_v5 = vpop.f32.mrf.mxu0 }
 0x14e   : > { %v740_v7 = vadd.f32 %v739_v0, %v686_v5 }
 0x14f   : > { %v688_v8 = vpop.f32.mrf.mxu0 }
 0x150   : > { %v742_v9 = vadd.f32 %v741_v1, %v688_v8 }
 0x151   : > { %v690_v11 = vpop.f32.mrf.mxu0 }
 0x152   : > { %v744_v12 = vadd.f32 %v743_v2, %v690_v11 }
 0x153   : > { %v694_v13 = vpop.f32.mrf.mxu0 }
 0x154   : > { %v748_v14 = vadd.f32 %v747_v6, %v694_v13 }
 0x155   : > { %v696_v16 = vpop.f32.mrf.mxu0 }
 0x156   : > { %v750_v17 = vadd.f32 %v749_v10, %v696_v16  ;;  %759 = sbr.rel (%p1083_p10) target bundleno = 351 (0x15f), region = 66 }
 0x157   : > { %v698_v18 = vpop.f32.mrf.mxu0 }
 0x158   : > { %v752_v19 = vadd.f32 %v751_v15, %v698_v18 }
 0x159   : > { %v700_v21 = vpop.f32.mrf.mxu0 }
 0x15a   : > { %v754_v22 = vadd.f32 %v753_v20, %v700_v21 }
 0x15b   : > { %760 = vst [vmem:[#allocation2 + $0x30] sm:$0xff] %v738_v4  ;;  %761 = vst [vmem:[#allocation2] sm:$0xff] %v740_v7 }
 0x15c   : > { %762 = vst [vmem:[#allocation2 + $0x18] sm:$0xff] %v742_v9  ;;  %763 = vst [vmem:[#allocation2 + $0x10] sm:$0xff] %v744_v12 }
 0x15d   : > { %764 = vst [vmem:[#allocation2 + $0x8] sm:$0xff] %v748_v14  ;;  %765 = vst [vmem:[#allocation2 + $0x20] sm:$0xff] %v750_v17 }
 0x15e   : > { %766 = vst [vmem:[#allocation2 + $0x28] sm:$0xff] %v752_v19  ;;  %767 = vst [vmem:[#allocation2 + $0x38] sm:$0xff] %v754_v22 }
 0x15f PF: > { %p1084_p11 = scmp.le.s32.totalorder %s1361_s17, 0 }
 0x161   : > { %771 = sbr.rel (%p1084_p11) target bundleno = 365 (0x16d), region = 70 }
 0x166   : > { %v772_v23 = vld [vmem:[#allocation2 + $0x30] sm:$0xff]  ;;  %v773_v24 = vld [vmem:[#allocation2] sm:$0xff]  ;;  %v774_v25 = vld [vmem:[#allocation2 + $0x18] sm:$0xff] }
 0x167   : > { %v780_v26 = vadd.f32 %v772_v23, %v738_v4  ;;  %v781_v27 = vadd.f32 %v773_v24, %v740_v7  ;;  %v782_v28 = vadd.f32 %v774_v25, %v742_v9  ;;  %v775_v29 = vld [vmem:[#allocation2 + $0x10] sm:$0xff]  ;;  %v776_v30 = vld [vmem:[#allocation2 + $0x8] sm:$0xff]  ;;  %v777_v31 = vld [vmem:[#allocation2 + $0x20] sm:$0xff] }
 0x168   : > { %v783_v32 = vadd.f32 %v775_v29, %v744_v12  ;;  %v784_v33 = vadd.f32 %v776_v30, %v748_v14  ;;  %v785_v34 = vadd.f32 %v777_v31, %v750_v17  ;;  %v778_v35 = vld [vmem:[#allocation2 + $0x28] sm:$0xff]  ;;  %v779_v36 = vld [vmem:[#allocation2 + $0x38] sm:$0xff] }
 0x169   : > { %788 = vst [vmem:[#allocation2 + $0x30] sm:$0xff] %v780_v26  ;;  %789 = vst [vmem:[#allocation2] sm:$0xff] %v781_v27  ;;  %v786_v37 = vadd.f32 %v778_v35, %v752_v19  ;;  %v787_v38 = vadd.f32 %v779_v36, %v754_v22 }
 0x16a   : > { %790 = vst [vmem:[#allocation2 + $0x18] sm:$0xff] %v782_v28  ;;  %791 = vst [vmem:[#allocation2 + $0x10] sm:$0xff] %v783_v32 }
 0x16b   : > { %792 = vst [vmem:[#allocation2 + $0x8] sm:$0xff] %v784_v33  ;;  %793 = vst [vmem:[#allocation2 + $0x20] sm:$0xff] %v785_v34 }
 0x16c   : > { %794 = vst [vmem:[#allocation2 + $0x28] sm:$0xff] %v786_v37  ;;  %795 = vst [vmem:[#allocation2 + $0x38] sm:$0xff] %v787_v38 }
 0x16d PF: > { %p1085_p12 = scmp.ne.s32.totalorder %s1361_s17, 2 }
 0x16f   : > { %799 = sbr.rel (%p1085_p12) target bundleno = 388 (0x184), region = 74 }
 0x174   : > { %v810_v39 = vlaneseq  ;;  %v808_v41 = vld [vmem:[%s1527_s9] sm:$0x3]  ;;  %v800_v42 = vld [vmem:[#allocation2 + $0x30] sm:$0xff]  ;;  %v802_v46 = vld [vmem:[#allocation2 + $0x18] sm:$0xff] }
 0x175   : > { %v801_v43 = vld [vmem:[#allocation2] sm:$0xff]  ;;  %v803_v47 = vld [vmem:[#allocation2 + $0x10] sm:$0xff]  ;;  %v804_v48 = vld [vmem:[#allocation2 + $0x8] sm:$0xff] }
 0x176   : > { %v811_v40 = vshrl.u32 %v810_v39, 7  ;;  %v805_v51 = vld [vmem:[#allocation2 + $0x20] sm:$0xff]  ;;  %v806_v52 = vld [vmem:[#allocation2 + $0x28] sm:$0xff]  ;;  %v807_v53 = vld [vmem:[#allocation2 + $0x38] sm:$0xff] }
 0x178   : > { %v812_v44 = vsub.s32 0, %v811_v40  ;;  %v816_v45 = vsub.s32 1, %v811_v40 }
 0x17a   : > { %v813_v49 = vrot.slane %v808_v41, %v812_v44  ;;  %v817_v50 = vrot.slane %v808_v41, %v816_v45 }
 0x17c   : > { %v820_v54 = vadd.f32 %v813_v49, %v800_v42  ;;  %v821_v55 = vadd.f32 %v817_v50, %v801_v43  ;;  %v822_v56 = vadd.f32 %v813_v49, %v802_v46  ;;  %v823_v57 = vadd.f32 %v817_v50, %v803_v47 }
 0x17d   : > { %v824_v58 = vadd.f32 %v813_v49, %v804_v48  ;;  %v825_v59 = vadd.f32 %v817_v50, %v805_v51  ;;  %v826_v60 = vadd.f32 %v813_v49, %v806_v52  ;;  %v827_v61 = vadd.f32 %v817_v50, %v807_v53 }
 0x17e   : > { %v828_v62 = vmax.f32 %v820_v54, 0.0  ;;  %v829_v63 = vmax.f32 %v821_v55, 0.0  ;;  %v830_v0 = vmax.f32 %v822_v56, 0.0  ;;  %v831_v1 = vmax.f32 %v823_v57, 0.0 }
 0x17f   : > { %v832_v2 = vmax.f32 %v824_v58, 0.0  ;;  %v833_v3 = vmax.f32 %v825_v59, 0.0  ;;  %v834_v4 = vmax.f32 %v826_v60, 0.0  ;;  %v835_v5 = vmax.f32 %v827_v61, 0.0 }
 0x180   : > { %v1094_v6 = vpack.c.bf16 %v829_v63, %v828_v62  ;;  %v1095_v7 = vpack.c.bf16 %v831_v1, %v830_v0 }
 0x181   : > { %v1096_v8 = vpack.c.bf16 %v833_v3, %v832_v2  ;;  %v1097_v9 = vpack.c.bf16 %v835_v5, %v834_v4 }
 0x182   : > { %860 = vst [vmem:[%s1532_s28] sm:$0xff] %v1094_v6  ;;  %861 = vst [vmem:[%s1532_s28 + $0x8] sm:$0xff] %v1095_v7 }
 0x183   : > { %862 = vst [vmem:[%s1532_s28 + $0x10] sm:$0xff] %v1096_v8  ;;  %863 = vst [vmem:[%s1532_s28 + $0x18] sm:$0xff] %v1097_v9 }
 0x184 PF: > { %s16_s21 = sadd.s32 1, %s1377_s21   ;;  %s1638_s12 = smov %s1345_s13 }
 0x185   : > { %p13_p13 = scmp.ge.s32.totalorder %s16_s21, 8   ;;  %s1639_s13 = smov %s1349_s14 }
 0x186   : > { %s1640_s14 = smov %s1487_s6  ;;  %s1641_s15 = smov %s1357_s16 }
 0x187   : > { %s1642_s16 = smov %s1490_s7  ;;  %s1643_s17 = smov %s1369_s19 }
 0x188   : > { %s1644_s18 = smov %s1373_s20  ;;  %s1645_s19 = smov %s1648_s23 }
 0x189   : > { %s1646_s20 = smov %s1652_s24  ;;  %15 = sbr.rel (!%p13_p13) target bundleno = 8 (0x8), region = 128 }
 0x18e   :  { %896 = vsyncpa [#allocation5], 1 }
 0x18f   :  { %898 = vsyncpa [#allocation5 + $0x1], 1 }

// kernel: net_forward.8
= control target key start
LH: loop header
LB: loop body
LE: loop exit
PB: predicated region body
PF: predicated region fallthrough
CT: control target
= control target key end

     0   :  { %s1607_s12 = smov 0   ;;  %s1609_s13 = smov 0   ;;  %s1796_s0 = inlined_call_operand.vmem [shape: bf16[2,8,2304], index: 0, kind: input, shape index: {}]   ;;  %s1797_s1 = inlined_call_operand.vmem [shape: bf16[2,2304,512], index: 1, kind: input, shape index: {}]   ;;  %s1798_s2 = inlined_call_operand.vmem [shape: f32[2,1,512], index: 2, kind: input, shape index: {}]   ;;  %s1799_s3 = inlined_call_operand.vmem [shape: bf16[2,8,512], index: 3, kind: output, shape index: {}]  }
   0x1   :  { %s1611_s14 = smov 0   ;;  %s1613_s15 = smov 0  }
   0x2   :  { %s1615_s16 = smov 0  }
   0x3 LB: > { %s25_s17 = sadd.s32 1, %s1576_s14  ;;  %s32_s18 = sadd.s32 1, %s1580_s15  ;;  %s1584_s16 = sphi %s1615_s16, %s13_s16   ;;  %s1580_s15 = sphi %s1613_s15, %s1803_s15   ;;  %s1576_s14 = sphi %s1611_s14, %s1802_s14   ;;  %s1572_s13 = sphi %s1609_s13, %s1801_s13   ;;  %s1568_s12 = sphi %s1607_s12, %s1800_s12  }
   0x4   : > { %p26_p0 = scmp.ge.s32.totalorder %s25_s17, 6  ;;  %p1238_p1 = scmp.ge.s32.totalorder %s1584_s16, 1 }
   0x5   : > { %p190_p2 = scmp.lt.s32.totalorder %s1584_s16, 13 }
   0x6   : > { %s1805_s17 = smov (%p26_p0, %s25_s17), 0  ;;  %s1807_s18 = smov (!%p26_p0, %s32_s18), %s1580_s15 }
   0x7   : > { %p191_p3 = pnand %p1238_p1, %p190_p2  ;;  %p34_p4 = scmp.ge.s32.totalorder %s1807_s18, 2 }
   0x8   : > { %p236_p5 = scmp.lt.s32.totalorder (!%p191_p3), %s1572_s13, 1  ;;  %s268_s19 = smul.u32 (!%p191_p3), 384, %s1568_s12 }
   0x9   : > { %s1809_s18 = smov (%p34_p4, %s1807_s18), 0  ;;  %194 = sbr.rel (%p191_p3) target bundleno = 352 (0x160), region = 32 }
   0xa   : > { %s269_s20 = sshra.s32 (!%p191_p3), %s268_s19, 3  ;;  %s235_s8 = smul.u32 (!%p191_p3), 3, %s1568_s12 }
   0xb   : > { %s1353_s6 = sshll.u32 (!%p191_p3), %s269_s20, 4  ;;  %p1345_p7 = scmp.ne.s32.totalorder (!%p191_p3), %s1568_s12, 0 }
   0xc   : > { %p240_p6 = scmp.lt.s32.totalorder (!%p191_p3), %s235_s8, 17 }
   0xe   : > { %v1586_v0 = vmov 0   ;;  %s1811_s13 = smov (!%p236_p5, %s1572_s13), 1  ;;  %s1813_s8 = smov (!%p240_p6, %s235_s8), 17 }
   0xf   : > { %936 = vmatprep.mubr.bf16.mxu1 %v1586_v0  ;;  %s1357_s21 = smul.u32 4608, %s1811_s13  ;;  %s1241_s22 = sshll.u32 %s1811_s13, 2 }
  0x10   : > { %s1648_s25 = scalar_lea.vmem %s1798_s2, %s1241_s22  ;;  %s1352_s26 = sshll.u32 %s1811_s13, 4 }
  0x11   : > { %s253_s29 = scalar_lea.vmem %s1797_s1, %s1357_s21  ;;  %s1657_s5 = scalar_lea.vmem %s1799_s3, %s1352_s26 }
  0x12   : > { %s1659_s7 = scalar_lea.vmem %s253_s29, %s1353_s6  ;;  %s1356_s9 = smul.u32 18, %s1811_s13 }
  0x13   : > { %v1399_v1 = vld [vmem:[%s1659_s7 + $0xe4] ss:$16 sps:$4 sm:$0xff]   ;;  %v1403_v3 = vld [vmem:[%s1659_s7 + $0xe0] ss:$16 sps:$4 sm:$0xff]   ;;  %v1452_v34 = vld [vmem:[%s1659_s7 + $0xec] ss:$16 sps:$4 sm:$0xff]  }
  0x14   : > { %v1401_v2 = vld [vmem:[%s1659_s7 + $0x2e4] ss:$16 sps:$4 sm:$0xff]   ;;  %863 = vmatprep.subr.bf16.mxu0 %v1399_v1  ;;  %v1404_v4 = vld [vmem:[%s1659_s7 + $0x2e0] ss:$16 sps:$4 sm:$0xff]   ;;  %s245_s10 = sadd.s32 %s1356_s9, %s1813_s8  ;;  %v1450_v36 = vld [vmem:[%s1659_s7 + $0xe8] ss:$16 sps:$4 sm:$0xff]  }
  0x15   : > { %904 = vmatprep.subr.bf16.mxu1 %v1401_v2  ;;  %v1405_v5 = vld [vmem:[%s1659_s7 + $0xc4] ss:$16 sps:$4 sm:$0xff]   ;;  %864 = vmatpush1.bf16.msra.mxu0 %v1403_v3  ;;  %v1409_v7 = vld [vmem:[%s1659_s7 + $0xc0] ss:$16 sps:$4 sm:$0xff]   ;;  %s1239_s11 = sshll.u32 %s245_s10, 2 }
  0x16   : > { %905 = vmatpush1.bf16.msra.mxu1 %v1404_v4  ;;  %v1407_v6 = vld [vmem:[%s1659_s7 + $0x2c4] ss:$16 sps:$4 sm:$0xff]   ;;  %865 = vmatprep.subr.bf16.mxu0 %v1405_v5  ;;  %v1410_v8 = vld [vmem:[%s1659_s7 + $0x2c0] ss:$16 sps:$4 sm:$0xff]   ;;  %s1692_s20 = scalar_lea.vmem %s1796_s0, %s1239_s11  ;;  %v1458_v39 = vld [vmem:[%s1659_s7 + $0xcc] ss:$16 sps:$4 sm:$0xff]  }
  0x17   : > { %906 = vmatprep.subr.bf16.mxu1 %v1407_v6  ;;  %v1411_v9 = vld [vmem:[%s1659_s7 + $0xa4] ss:$16 sps:$4 sm:$0xff]   ;;  %v1415_v11 = vld [vmem:[%s1659_s7 + $0xa0] ss:$16 sps:$4 sm:$0xff]   ;;  %v1703_v35 = vld [vmem:[%s1692_s20 + $0x8] ss:$0 sps:$4 sm:$0xff]  }
  0x18   : > { %v1413_v10 = vld [vmem:[%s1659_s7 + $0x2a4] ss:$16 sps:$4 sm:$0xff]   ;;  %v1416_v12 = vld [vmem:[%s1659_s7 + $0x2a0] ss:$16 sps:$4 sm:$0xff]   ;;  %v1456_v40 = vld [vmem:[%s1659_s7 + $0xc8] ss:$16 sps:$4 sm:$0xff]  }
  0x19   : > { %866 = vmatpush1.bf16.msra.mxu0 %v1409_v7  ;;  %v1417_v13 = vld [vmem:[%s1659_s7 + $0x84] ss:$16 sps:$4 sm:$0xff]   ;;  %v1421_v15 = vld [vmem:[%s1659_s7 + $0x80] ss:$16 sps:$4 sm:$0xff]   ;;  %v1464_v43 = vld [vmem:[%s1659_s7 + $0xac] ss:$16 sps:$4 sm:$0xff]  }
  0x1a   : > { %907 = vmatpush1.bf16.msra.mxu1 %v1410_v8  ;;  %867 = vmatprep.subr.bf16.mxu0 %v1411_v9  ;;  %v1419_v14 = vld [vmem:[%s1659_s7 + $0x284] ss:$16 sps:$4 sm:$0xff]   ;;  %v1422_v16 = vld [vmem:[%s1659_s7 + $0x280] ss:$16 sps:$4 sm:$0xff]   ;;  %v1462_v44 = vld [vmem:[%s1659_s7 + $0xa8] ss:$16 sps:$4 sm:$0xff]  }
  0x1b   : > { %908 = vmatprep.subr.bf16.mxu1 %v1413_v10  ;;  %v1423_v17 = vld [vmem:[%s1659_s7 + $0x64] ss:$16 sps:$4 sm:$0xff]   ;;  %v1427_v19 = vld [vmem:[%s1659_s7 + $0x60] ss:$16 sps:$4 sm:$0xff]   ;;  %v1470_v47 = vld [vmem:[%s1659_s7 + $0x8c] ss:$16 sps:$4 sm:$0xff]  }
  0x1c   : > { %v1425_v18 = vld [vmem:[%s1659_s7 + $0x264] ss:$16 sps:$4 sm:$0xff]   ;;  %v1428_v20 = vld [vmem:[%s1659_s7 + $0x260] ss:$16 sps:$4 sm:$0xff]   ;;  %v1468_v48 = vld [vmem:[%s1659_s7 + $0x88] ss:$16 sps:$4 sm:$0xff]  }
  0x1d   : > { %868 = vmatpush1.bf16.msra.mxu0 %v1415_v11  ;;  %v1429_v21 = vld [vmem:[%s1659_s7 + $0x44] ss:$16 sps:$4 sm:$0xff]   ;;  %v1433_v23 = vld [vmem:[%s1659_s7 + $0x40] ss:$16 sps:$4 sm:$0xff]   ;;  %v1476_v53 = vld [vmem:[%s1659_s7 + $0x6c] ss:$16 sps:$4 sm:$0xff]  }
  0x1e   : > { %909 = vmatpush1.bf16.msra.mxu1 %v1416_v12  ;;  %869 = vmatprep.subr.bf16.mxu0 %v1417_v13  ;;  %v1431_v22 = vld [vmem:[%s1659_s7 + $0x244] ss:$16 sps:$4 sm:$0xff]   ;;  %v1434_v24 = vld [vmem:[%s1659_s7 + $0x240] ss:$16 sps:$4 sm:$0xff]   ;;  %v1474_v54 = vld [vmem:[%s1659_s7 + $0x68] ss:$16 sps:$4 sm:$0xff]  }
  0x1f   : > { %910 = vmatprep.subr.bf16.mxu1 %v1419_v14  ;;  %v1435_v25 = vld [vmem:[%s1659_s7 + $0x24] ss:$16 sps:$4 sm:$0xff]   ;;  %v1439_v27 = vld [vmem:[%s1659_s7 + $0x20] ss:$16 sps:$4 sm:$0xff]   ;;  %v1482_v57 = vld [vmem:[%s1659_s7 + $0x4c] ss:$16 sps:$4 sm:$0xff]  }
  0x20   : > { %v1437_v26 = vld [vmem:[%s1659_s7 + $0x224] ss:$16 sps:$4 sm:$0xff]   ;;  %v1440_v28 = vld [vmem:[%s1659_s7 + $0x220] ss:$16 sps:$4 sm:$0xff]   ;;  %v1480_v58 = vld [vmem:[%s1659_s7 + $0x48] ss:$16 sps:$4 sm:$0xff]  }
  0x21   : > { %870 = vmatpush1.bf16.msra.mxu0 %v1421_v15  ;;  %v1441_v29 = vld [vmem:[%s1659_s7 + $0x4] ss:$16 sps:$4 sm:$0xff]   ;;  %v1445_v31 = vld [vmem:[%s1659_s7] ss:$16 sps:$4 sm:$0xff]   ;;  %v1488_v61 = vld [vmem:[%s1659_s7 + $0x2c] ss:$16 sps:$4 sm:$0xff]  }
  0x22   : > { %911 = vmatpush1.bf16.msra.mxu1 %v1422_v16  ;;  %871 = vmatprep.subr.bf16.mxu0 %v1423_v17  ;;  %v1443_v30 = vld [vmem:[%s1659_s7 + $0x204] ss:$16 sps:$4 sm:$0xff]   ;;  %v1446_v32 = vld [vmem:[%s1659_s7 + $0x200] ss:$16 sps:$4 sm:$0xff]   ;;  %v1486_v62 = vld [vmem:[%s1659_s7 + $0x28] ss:$16 sps:$4 sm:$0xff]  }
  0x23   : > { %912 = vmatprep.subr.bf16.mxu1 %v1425_v18  ;;  %v1447_v33 = vld [vmem:[%s1659_s7 + $0x1e4] ss:$16 sps:$4 sm:$0xff]   ;;  %v1453_v37 = vld [vmem:[%s1659_s7 + $0x1e0] ss:$16 sps:$4 sm:$0xff]   ;;  %v1494_v2 = vld [vmem:[%s1659_s7 + $0xc] ss:$16 sps:$4 sm:$0xff]  }
  0x24   : > { %v1454_v38 = vld [vmem:[%s1659_s7 + $0x1c4] ss:$16 sps:$4 sm:$0xff]   ;;  %v1459_v41 = vld [vmem:[%s1659_s7 + $0x1c0] ss:$16 sps:$4 sm:$0xff]   ;;  %v1492_v3 = vld [vmem:[%s1659_s7 + $0x8] ss:$16 sps:$4 sm:$0xff]  }
  0x25   : > { %872 = vmatpush1.bf16.msra.mxu0 %v1427_v19  ;;  %v1460_v42 = vld [vmem:[%s1659_s7 + $0x1a4] ss:$16 sps:$4 sm:$0xff]   ;;  %v1465_v45 = vld [vmem:[%s1659_s7 + $0x1a0] ss:$16 sps:$4 sm:$0xff]   ;;  %v1500_v5 = vld [vmem:[%s1659_s7 + $0x1ec] ss:$16 sps:$4 sm:$0xff]  }
  0x26   : > { %913 = vmatpush1.bf16.msra.mxu1 %v1428_v20  ;;  %873 = vmatprep.subr.bf16.mxu0 %v1429_v21  ;;  %v1466_v46 = vld [vmem:[%s1659_s7 + $0x184] ss:$16 sps:$4 sm:$0xff]   ;;  %v1471_v50 = vld [vmem:[%s1659_s7 + $0x180] ss:$16 sps:$4 sm:$0xff]   ;;  %v1503_v6 = vld [vmem:[%s1659_s7 + $0x2ec] ss:$16 sps:$4 sm:$0xff]  }
  0x27   : > { %914 = vmatprep.subr.bf16.mxu1 %v1431_v22  ;;  %v370_v49 = vld [vmem:[%s1692_s20] sm:$0xff]  ;;  %v1498_v8 = vld [vmem:[%s1659_s7 + $0x1e8] ss:$16 sps:$4 sm:$0xff]   ;;  %v1506_v10 = vld [vmem:[%s1659_s7 + $0x1cc] ss:$16 sps:$4 sm:$0xff]  }
  0x28   : > { %v1472_v51 = vld [vmem:[%s1659_s7 + $0x164] ss:$16 sps:$4 sm:$0xff]   ;;  %v1247_v52 = vcombine.high %v370_v49, %v370_v49  ;;  %v1477_v55 = vld [vmem:[%s1659_s7 + $0x160] ss:$16 sps:$4 sm:$0xff]   ;;  %v1739_v7 = vcombine.low %v370_v49, %v370_v49  ;;  %v1501_v9 = vld [vmem:[%s1659_s7 + $0x2e8] ss:$16 sps:$4 sm:$0xff]  }
  0x29   : > { %874 = vmatpush1.bf16.msra.mxu0 %v1433_v23  ;;  %v1478_v56 = vld [vmem:[%s1659_s7 + $0x144] ss:$16 sps:$4 sm:$0xff]   ;;  %v1483_v59 = vld [vmem:[%s1659_s7 + $0x140] ss:$16 sps:$4 sm:$0xff]   ;;  %v1509_v11 = vld [vmem:[%s1659_s7 + $0x2cc] ss:$16 sps:$4 sm:$0xff]  }
  0x2a   : > { %915 = vmatpush1.bf16.msra.mxu1 %v1434_v24  ;;  %875 = vmatprep.subr.bf16.mxu0 %v1435_v25  ;;  %v1484_v60 = vld [vmem:[%s1659_s7 + $0x124] ss:$16 sps:$4 sm:$0xff]   ;;  %v1489_v63 = vld [vmem:[%s1659_s7 + $0x120] ss:$16 sps:$4 sm:$0xff]   ;;  %v1504_v12 = vld [vmem:[%s1659_s7 + $0x1c8] ss:$16 sps:$4 sm:$0xff]  }
  0x2b   : > { %916 = vmatprep.subr.bf16.mxu1 %v1437_v26  ;;  %895 = vmatprep.mubr.bf16.mxu0 %v1247_v52  ;;  %v1490_v1 = vld [vmem:[%s1659_s7 + $0x104] ss:$16 sps:$4 sm:$0xff]   ;;  %v1495_v4 = vld [vmem:[%s1659_s7 + $0x100] ss:$16 sps:$4 sm:$0xff]   ;;  %v1507_v13 = vld [vmem:[%s1659_s7 + $0x2c8] ss:$16 sps:$4 sm:$0xff]  }
  0x2c   : > { %v1512_v14 = vld [vmem:[%s1659_s7 + $0x1ac] ss:$16 sps:$4 sm:$0xff]   ;;  %v1510_v16 = vld [vmem:[%s1659_s7 + $0x1a8] ss:$16 sps:$4 sm:$0xff]  }
  0x2d   : > { %876 = vmatpush1.bf16.msra.mxu0 %v1439_v27  ;;  %v1515_v15 = vld [vmem:[%s1659_s7 + $0x2ac] ss:$16 sps:$4 sm:$0xff]   ;;  %v1513_v17 = vld [vmem:[%s1659_s7 + $0x2a8] ss:$16 sps:$4 sm:$0xff]  }
  0x2e   : > { %917 = vmatpush1.bf16.msra.mxu1 %v1440_v28  ;;  %877 = vmatprep.subr.bf16.mxu0 %v1441_v29  ;;  %v1518_v18 = vld [vmem:[%s1659_s7 + $0x18c] ss:$16 sps:$4 sm:$0xff]   ;;  %v1516_v20 = vld [vmem:[%s1659_s7 + $0x188] ss:$16 sps:$4 sm:$0xff]  }
  0x2f   : > { %918 = vmatprep.subr.bf16.mxu1 %v1443_v30  ;;  %v1521_v19 = vld [vmem:[%s1659_s7 + $0x28c] ss:$16 sps:$4 sm:$0xff]   ;;  %v1519_v21 = vld [vmem:[%s1659_s7 + $0x288] ss:$16 sps:$4 sm:$0xff]  }
  0x30   : > { %v1527_v22 = vld [vmem:[%s1659_s7 + $0x26c] ss:$16 sps:$4 sm:$0xff]   ;;  %v1522_v23 = vld [vmem:[%s1659_s7 + $0x168] ss:$16 sps:$4 sm:$0xff]  }
  0x31   : > { %878 = vmatpush1.bf16.msra.mxu0 %v1445_v31  ;;  %v1525_v24 = vld [vmem:[%s1659_s7 + $0x268] ss:$16 sps:$4 sm:$0xff]   ;;  %v1530_v25 = vld [vmem:[%s1659_s7 + $0x14c] ss:$16 sps:$4 sm:$0xff]  }
  0x32   : > { %919 = vmatpush1.bf16.msra.mxu1 %v1446_v32  ;;  %879 = vmatprep.subr.bf16.mxu0 %v1447_v33  ;;  %v1533_v26 = vld [vmem:[%s1659_s7 + $0x24c] ss:$16 sps:$4 sm:$0xff]   ;;  %v1528_v27 = vld [vmem:[%s1659_s7 + $0x148] ss:$16 sps:$4 sm:$0xff]  }
  0x33   : > { %945 = vmatprep.subr.bf16.mxu1 %v1452_v34  ;;  %v1531_v28 = vld [vmem:[%s1659_s7 + $0x248] ss:$16 sps:$4 sm:$0xff]   ;;  %v1536_v29 = vld [vmem:[%s1659_s7 + $0x12c] ss:$16 sps:$4 sm:$0xff]  }
  0x34   : > { %v1539_v30 = vld [vmem:[%s1659_s7 + $0x22c] ss:$16 sps:$4 sm:$0xff]   ;;  %v1534_v31 = vld [vmem:[%s1659_s7 + $0x128] ss:$16 sps:$4 sm:$0xff]  }
  0x35   : > { %937 = vmatmul.mubr.bf16.vlgmr.msra.gmra.mxu1 %v1703_v35  ;;  %880 = vmatpush2.bf16.msra.mxu0 %v1453_v37  ;;  %v1537_v32 = vld [vmem:[%s1659_s7 + $0x228] ss:$16 sps:$4 sm:$0xff]   ;;  %v1542_v33 = vld [vmem:[%s1659_s7 + $0x10c] ss:$16 sps:$4 sm:$0xff]  }
  0x36   : > { %946 = vmatpush1.bf16.msra.mxu1 %v1450_v36  ;;  %881 = vmatprep.subr.bf16.mxu0 %v1454_v38  ;;  %v1545_v34 = vld [vmem:[%s1659_s7 + $0x20c] ss:$16 sps:$4 sm:$0xff]   ;;  %v1540_v36 = vld [vmem:[%s1659_s7 + $0x108] ss:$16 sps:$4 sm:$0xff]  }
  0x37   : > { %947 = vmatprep.subr.bf16.mxu1 %v1458_v39  ;;  %977 = vmatprep.mubr.bf16.mxu1 %v1247_v52  ;;  %v1543_v37 = vld [vmem:[%s1659_s7 + $0x208] ss:$16 sps:$4 sm:$0xff]  }
  0x39   : > { %882 = vmatpush2.bf16.msra.mxu0 %v1459_v41 }
  0x3a   : > { %948 = vmatpush1.bf16.msra.mxu1 %v1456_v40  ;;  %883 = vmatprep.subr.bf16.mxu0 %v1460_v42 }
  0x3b   : > { %949 = vmatprep.subr.bf16.mxu1 %v1464_v43 }
  0x3d   : > { %884 = vmatpush2.bf16.msra.mxu0 %v1465_v45 }
  0x3e   : > { %950 = vmatpush1.bf16.msra.mxu1 %v1462_v44  ;;  %885 = vmatprep.subr.bf16.mxu0 %v1466_v46 }
  0x3f   : > { %951 = vmatprep.subr.bf16.mxu1 %v1470_v47 }
  0x41   : > { %886 = vmatpush2.bf16.msra.mxu0 %v1471_v50 }
  0x42   : > { %952 = vmatpush1.bf16.msra.mxu1 %v1468_v48  ;;  %887 = vmatprep.subr.bf16.mxu0 %v1472_v51 }
  0x43   : > { %953 = vmatprep.subr.bf16.mxu1 %v1476_v53 }
  0x45   : > { %888 = vmatpush2.bf16.msra.mxu0 %v1477_v55 }
  0x46   : > { %954 = vmatpush1.bf16.msra.mxu1 %v1474_v54  ;;  %889 = vmatprep.subr.bf16.mxu0 %v1478_v56 }
  0x47   : > { %955 = vmatprep.subr.bf16.mxu1 %v1482_v57 }
  0x49   : > { %890 = vmatpush2.bf16.msra.mxu0 %v1483_v59 }
  0x4a   : > { %956 = vmatpush1.bf16.msra.mxu1 %v1480_v58  ;;  %891 = vmatprep.subr.bf16.mxu0 %v1484_v60 }
  0x4b   : > { %957 = vmatprep.subr.bf16.mxu1 %v1488_v61 }
  0x4d   : > { %892 = vmatpush2.bf16.msra.mxu0 %v1489_v63 }
  0x4e   : > { %958 = vmatpush1.bf16.msra.mxu1 %v1486_v62  ;;  %893 = vmatprep.subr.bf16.mxu0 %v1490_v1 }
  0x4f   : > { %959 = vmatprep.subr.bf16.mxu1 %v1494_v2 }
  0x51   : > { %894 = vmatpush2.bf16.msra.mxu0 %v1495_v4 }
  0x52   : > { %960 = vmatpush1.bf16.msra.mxu1 %v1492_v3  ;;  %986 = vmatprep.subr.bf16.mxu0 %v1503_v6 }
  0x53   : > { %961 = vmatprep.subr.bf16.mxu1 %v1500_v5 }
  0x54   : > { %896 = vmatmul.mubr.bf16.vlgmr.msra.gmra.mxu0 %v1739_v7 }
  0x55   : > { %987 = vmatpush1.bf16.msra.mxu0 %v1501_v9  ;;  %1018 = vmatprep.mubr.bf16.mxu0 %v1586_v0  ;;  %v1524_v0 = vld [vmem:[%s1659_s7 + $0x16c] ss:$16 sps:$4 sm:$0xff]  }
  0x56   : > { %962 = vmatpush2.bf16.msra.mxu1 %v1498_v8  ;;  %988 = vmatprep.subr.bf16.mxu0 %v1509_v11 }
  0x57   : > { %963 = vmatprep.subr.bf16.mxu1 %v1506_v10 }
  0x59   : > { %989 = vmatpush1.bf16.msra.mxu0 %v1507_v13 }
  0x5a   : > { %964 = vmatpush2.bf16.msra.mxu1 %v1504_v12  ;;  %990 = vmatprep.subr.bf16.mxu0 %v1515_v15 }
  0x5b   : > { %965 = vmatprep.subr.bf16.mxu1 %v1512_v14 }
  0x5d   : > { %991 = vmatpush1.bf16.msra.mxu0 %v1513_v17 }
  0x5e   : > { %966 = vmatpush2.bf16.msra.mxu1 %v1510_v16  ;;  %992 = vmatprep.subr.bf16.mxu0 %v1521_v19 }
  0x5f   : > { %967 = vmatprep.subr.bf16.mxu1 %v1518_v18 }
  0x61   : > { %993 = vmatpush1.bf16.msra.mxu0 %v1519_v21 }
  0x62   : > { %968 = vmatpush2.bf16.msra.mxu1 %v1516_v20  ;;  %994 = vmatprep.subr.bf16.mxu0 %v1527_v22 }
  0x63   : > { %969 = vmatprep.subr.bf16.mxu1 %v1524_v0 }
  0x65   : > { %995 = vmatpush1.bf16.msra.mxu0 %v1525_v24 }
  0x66   : > { %970 = vmatpush2.bf16.msra.mxu1 %v1522_v23  ;;  %996 = vmatprep.subr.bf16.mxu0 %v1533_v26 }
  0x67   : > { %971 = vmatprep.subr.bf16.mxu1 %v1530_v25 }
  0x69   : > { %997 = vmatpush1.bf16.msra.mxu0 %v1531_v28 }
  0x6a   : > { %972 = vmatpush2.bf16.msra.mxu1 %v1528_v27  ;;  %998 = vmatprep.subr.bf16.mxu0 %v1539_v30 }
  0x6b   : > { %973 = vmatprep.subr.bf16.mxu1 %v1536_v29 }
  0x6d   : > { %999 = vmatpush1.bf16.msra.mxu0 %v1537_v32 }
  0x6e   : > { %974 = vmatpush2.bf16.msra.mxu1 %v1534_v31  ;;  %1000 = vmatprep.subr.bf16.mxu0 %v1545_v34 }
  0x6f   : > { %975 = vmatprep.subr.bf16.mxu1 %v1542_v33 }
  0x71   : > { %1001 = vmatpush1.bf16.msra.mxu0 %v1543_v37 }
  0x72   : > { %976 = vmatpush2.bf16.msra.mxu1 %v1540_v36 }
  0x74   : > { %1019 = vmatmul.mubr.bf16.vlgmr.msra.gmra.mxu0 %v1703_v35 }
  0x75   : > { %978 = vmatmul.mubr.bf16.vlgmr.msra.gmra.mxu1 %v1739_v7 }
  0xf5   : > { %v938_v38 = vpop.f32.mrf.mxu1 }
  0xf7   : > { %v940_v39 = vpop.f32.mrf.mxu1 }
  0xf9   : > { %v942_v40 = vpop.f32.mrf.mxu1 }
  0xfb   : > { %v943_v41 = vpop.f32.mrf.mxu1 }
 0x114   : > { %v897_v42 = vpop.f32.mrf.mxu0 }
 0x115   : > { %v939_v43 = vadd.f32 %v938_v38, %v897_v42 }
 0x116   : > { %v899_v44 = vpop.f32.mrf.mxu0 }
 0x117   : > { %v941_v45 = vadd.f32 %v940_v39, %v899_v44 }
 0x118   : > { %v901_v46 = vpop.f32.mrf.mxu0 }
 0x11a   : > { %v902_v47 = vpop.f32.mrf.mxu0 }
 0x134   : > { %v1020_v49 = vpop.f32.mrf.mxu0 }
 0x135   : > { %v979_v48 = vpop.f32.mrf.mxu1 }
 0x136   : > { %v1021_v50 = vadd.f32 %v1020_v49, %v979_v48  ;;  %v1022_v52 = vpop.f32.mrf.mxu0 }
 0x137   : > { %v981_v51 = vpop.f32.mrf.mxu1  ;;  %1030 = sbr.rel (%p1345_p7) target bundleno = 318 (0x13e), region = 36 }
 0x138   : > { %v1023_v53 = vadd.f32 %v1022_v52, %v981_v51  ;;  %v1024_v55 = vpop.f32.mrf.mxu0 }
 0x139   : > { %v983_v54 = vpop.f32.mrf.mxu1 }
 0x13a   : > { %v1025_v35 = vpop.f32.mrf.mxu0 }
 0x13b   : > { %v984_v56 = vpop.f32.mrf.mxu1 }
 0x13c   : > { %1031 = vst [vmem:[#allocation2 + $0x10] sm:$0xff] %v939_v43  ;;  %1032 = vst [vmem:[#allocation2] sm:$0xff] %v941_v45 }
 0x13d   : > { %1033 = vst [vmem:[#allocation2 + $0x18] sm:$0xff] %v1021_v50  ;;  %1034 = vst [vmem:[#allocation2 + $0x8] sm:$0xff] %v1023_v53 }
 0x13e PF: > { %p1346_p8 = scmp.le.s32.totalorder %s1568_s12, 0 }
 0x140   : > { %1038 = sbr.rel (%p1346_p8) target bundleno = 330 (0x14a), region = 40 }
 0x145   : > { %v1039_v57 = vld [vmem:[#allocation2 + $0x10] sm:$0xff]  ;;  %v1040_v58 = vld [vmem:[#allocation2] sm:$0xff]  ;;  %v1041_v59 = vld [vmem:[#allocation2 + $0x18] sm:$0xff] }
 0x146   : > { %v1043_v60 = vadd.f32 %v1039_v57, %v939_v43  ;;  %v1044_v61 = vadd.f32 %v1040_v58, %v941_v45  ;;  %v1045_v62 = vadd.f32 %v1041_v59, %v1021_v50  ;;  %v1042_v63 = vld [vmem:[#allocation2 + $0x8] sm:$0xff] }
 0x147   : > { %v1046_v1 = vadd.f32 %v1042_v63, %v1023_v53 }
 0x148   : > { %1047 = vst [vmem:[#allocation2 + $0x10] sm:$0xff] %v1043_v60  ;;  %1048 = vst [vmem:[#allocation2] sm:$0xff] %v1044_v61 }
 0x149   : > { %1049 = vst [vmem:[#allocation2 + $0x18] sm:$0xff] %v1045_v62  ;;  %1050 = vst [vmem:[#allocation2 + $0x8] sm:$0xff] %v1046_v1 }
 0x14a PF: > { %p1347_p9 = scmp.ne.s32.totalorder %s1568_s12, 5 }
 0x14c   : > { %1054 = sbr.rel (%p1347_p9) target bundleno = 352 (0x160), region = 44 }
 0x151   : > { %v1061_v2 = vlaneseq  ;;  %v1059_v4 = vld [vmem:[%s1648_s25] sm:$0xf]  ;;  %v1055_v5 = vld [vmem:[#allocation2 + $0x10] sm:$0xff]  ;;  %v1057_v11 = vld [vmem:[#allocation2 + $0x18] sm:$0xff] }
 0x152   : > { %v1056_v10 = vld [vmem:[#allocation2] sm:$0xff]  ;;  %v1058_v12 = vld [vmem:[#allocation2 + $0x8] sm:$0xff] }
 0x153   : > { %v1062_v3 = vshrl.u32 %v1061_v2, 7 }
 0x155   : > { %v1063_v6 = vsub.s32 0, %v1062_v3  ;;  %v1067_v7 = vsub.s32 1, %v1062_v3  ;;  %v1071_v8 = vsub.s32 2, %v1062_v3  ;;  %v1075_v9 = vsub.s32 3, %v1062_v3 }
 0x157   : > { %v1064_v13 = vrot.slane %v1059_v4, %v1063_v6  ;;  %v1068_v14 = vrot.slane %v1059_v4, %v1067_v7  ;;  %v1072_v15 = vrot.slane %v1059_v4, %v1071_v8  ;;  %v1076_v16 = vrot.slane %v1059_v4, %v1075_v9 }
 0x159   : > { %v1081_v17 = vadd.f32 %v1064_v13, %v1055_v5  ;;  %v1082_v18 = vadd.f32 %v1068_v14, %v1056_v10  ;;  %v1083_v19 = vadd.f32 %v1072_v15, %v1057_v11  ;;  %v1084_v20 = vadd.f32 %v1076_v16, %v1058_v12 }
 0x15b   : > { %v1085_v21 = vmax.f32 %v1081_v17, 0.0  ;;  %v1086_v0 = vmax.f32 %v1082_v18, 0.0  ;;  %v1087_v22 = vmax.f32 %v1083_v19, 0.0  ;;  %v1088_v23 = vmax.f32 %v1084_v20, 0.0 }
 0x15d   : > { %v1354_v24 = vpack.c.bf16 %v1086_v0, %v1085_v21  ;;  %v1355_v25 = vpack.c.bf16 %v1088_v23, %v1087_v22 }
 0x15f   : > { %1105 = vst [vmem:[%s1657_s5] sm:$0xff] %v1354_v24  ;;  %1106 = vst [vmem:[%s1657_s5 + $0x8] sm:$0xff] %v1355_v25 }
 0x160 PF: > { %s13_s16 = sadd.s32 1, %s1584_s16   ;;  %s1800_s12 = smov %s1576_s14 }
 0x161   : > { %p10_p10 = scmp.ge.s32.totalorder %s13_s16, 14   ;;  %s1801_s13 = smov %s1580_s15 }
 0x162   : > { %s1802_s14 = smov %s1805_s17  ;;  %s1803_s15 = smov %s1809_s18 }
 0x163   :  { %12 = sbr.rel (!%p10_p10) target bundleno = 3 (0x3), region = 81 }

// kernel: net_forward.9
= control target key start
LH: loop header
LB: loop body
LE: loop exit
PB: predicated region body
PF: predicated region fallthrough
CT: control target
= control target key end

     0   :  { %v114_v3 = vlaneseq  ;;  %s363_s0 = inlined_call_operand.vmem [shape: bf16[2,4,512], index: 0, kind: input, shape index: {}]   ;;  %s364_s1 = inlined_call_operand.vmem [shape: bf16[2,4,512], index: 1, kind: input, shape index: {}]   ;;  %s365_s2 = inlined_call_operand.hbm [shape: f32[2,512], index: 2, kind: output, shape index: {}]  }
   0x1   :  { %v12_v0 = vld [vmem:[%s363_s0] sm:$0xff]  ;;  %v13_v1 = vld [vmem:[%s363_s0 + $0x8] sm:$0xff] }
   0x2   :  { %v18_v2 = vld [vmem:[%s364_s1] sm:$0xff]  ;;  %v14_v4 = vunpack.c.l.bf16 %v12_v0  ;;  %v15_v5 = vunpack.c.h.bf16 %v12_v0  ;;  %v16_v6 = vunpack.c.l.bf16 %v13_v1  ;;  %v17_v7 = vunpack.c.h.bf16 %v13_v1  ;;  %v19_v8 = vld [vmem:[%s364_s1 + $0x8] sm:$0xff] }
   0x3   :  { %7 = vsyncpa [#allocation3], 0  ;;  %v20_v9 = vunpack.c.l.bf16 %v18_v2  ;;  %v21_v10 = vunpack.c.h.bf16 %v18_v2  ;;  %v22_v11 = vunpack.c.l.bf16 %v19_v8  ;;  %v23_v12 = vunpack.c.h.bf16 %v19_v8  ;;  %s315_s0 = smov [#allocation2]  }
   0x4   :  { %vm40_vm0 = vcmask 1043456   ;;  %v313_v13 = vmov 1983009808   ;;  %v346_v20 = vshrl.u32 %v114_v3, 7  ;;  %vm148_vm1 = vcmask 1041409   ;;  %s278_s1 = sshll.u32 %s315_s0, 4  ;;  %s279_s1 = int_to_ptr.vmem [resolvable:$true] %s278_s1 }
   0x5   :  { %v343_v14 = vunpack.c.l.s4 %v313_v13  ;;  %v24_v15 = vadd.f32 %v20_v9, %v14_v4  ;;  %v25_v16 = vadd.f32 %v21_v10, %v15_v5  ;;  %v26_v17 = vadd.f32 %v22_v11, %v16_v6  ;;  %s291_s17 = scalar_lea.vmem %s279_s1, 128  ;;  %p296_p1 = scmp.lt.s32.totalorder %s279_s1, %s279_s1 }
   0x6   :  { %v27_v18 = vadd.f32 %v23_v12, %v17_v7  ;;  %vm150_vm2 = vcmask 1043459   ;;  %vm152_vm3 = vcmask 1045509   ;;  %vm154_vm4 = vcmask 1047559   ;;  %p292_p0 = scmp.ne.s32.totalorder %s279_s1, %s291_s17  ;;  %p297_p2 = scmp.lt.s32.totalorder %s291_s17, %s291_s17 }
   0x7   :  { %v113_v19 = vunpack.c.0.s8 %v343_v14  ;;  %v32_v21 = vcombine.high %v24_v15, %v24_v15  ;;  %v33_v22 = vcombine.high %v25_v16, %v25_v16  ;;  %v34_v23 = vcombine.high %v26_v17, %v26_v17 }
   0x8   :  { %v35_v24 = vcombine.high %v27_v18, %v27_v18  ;;  %v41_v25 = vsel %vm40_vm0, %v24_v15, 0.0  ;;  %v55_v26 = vsel %vm40_vm0, %v25_v16, 0.0  ;;  %v69_v27 = vsel %vm40_vm0, %v26_v17, 0.0  ;;  %p298_p3 = por %p297_p2, %p296_p1 }
   0x9   :  { %v83_v28 = vsel %vm40_vm0, %v27_v18, 0.0  ;;  %v42_v29 = vrot.slane %v41_v25, 4  ;;  %v48_v30 = vsel %vm40_vm0, %v32_v21, 0.0  ;;  %v56_v31 = vrot.slane %v55_v26, 4 }
   0xa   :  { %v62_v32 = vsel %vm40_vm0, %v33_v22, 0.0  ;;  %v49_v33 = vrot.slane %v48_v30, 4  ;;  %v70_v35 = vrot.slane %v69_v27, 4  ;;  %v76_v36 = vsel %vm40_vm0, %v34_v23, 0.0  ;;  %p299_p4 = pnand %p298_p3, %p292_p0 }
   0xb   :  { %v63_v34 = vrot.slane %v62_v32, 4  ;;  %v43_v37 = vadd.f32 %v42_v29, %v41_v25  ;;  %v57_v38 = vadd.f32 %v56_v31, %v55_v26  ;;  %v77_v39 = vrot.slane %v76_v36, 4 }
   0xc   :  { %v84_v40 = vrot.slane %v83_v28, 4  ;;  %v50_v41 = vadd.f32 %v49_v33, %v48_v30  ;;  %v71_v43 = vadd.f32 %v70_v35, %v69_v27  ;;  %v90_v44 = vsel %vm40_vm0, %v35_v24, 0.0 }
   0xd   :  { %v64_v42 = vadd.f32 %v63_v34, %v62_v32  ;;  %v44_v45 = vrot.slane %v43_v37, 2  ;;  %v58_v46 = vrot.slane %v57_v38, 2  ;;  %v78_v47 = vadd.f32 %v77_v39, %v76_v36 }
   0xe   :  { %v85_v48 = vadd.f32 %v84_v40, %v83_v28  ;;  %v51_v49 = vrot.slane %v50_v41, 2  ;;  %v72_v51 = vrot.slane %v71_v43, 2  ;;  %v91_v52 = vrot.slane %v90_v44, 4 }
   0xf   :  { %v65_v50 = vrot.slane %v64_v42, 2  ;;  %v45_v53 = vadd.f32 %v44_v45, %v43_v37  ;;  %v59_v54 = vadd.f32 %v58_v46, %v57_v38  ;;  %v79_v55 = vrot.slane %v78_v47, 2 }
  0x10   :  { %v86_v56 = vrot.slane %v85_v48, 2  ;;  %v52_v57 = vadd.f32 %v51_v49, %v50_v41  ;;  %v73_v59 = vadd.f32 %v72_v51, %v71_v43  ;;  %v92_v60 = vadd.f32 %v91_v52, %v90_v44 }
  0x11   :  { %v66_v58 = vadd.f32 %v65_v50, %v64_v42  ;;  %v46_v61 = vrot.slane %v45_v53, 1  ;;  %v60_v62 = vrot.slane %v59_v54, 1  ;;  %v80_v63 = vadd.f32 %v79_v55, %v78_v47 }
  0x12   :  { %v87_v0 = vadd.f32 %v86_v56, %v85_v48  ;;  %v53_v1 = vrot.slane %v52_v57, 1  ;;  %v74_v3 = vrot.slane %v73_v59, 1  ;;  %v93_v4 = vrot.slane %v92_v60, 2 }
  0x13   :  { %v67_v2 = vrot.slane %v66_v58, 1  ;;  %v47_v5 = vadd.f32 %v46_v61, %v45_v53  ;;  %v61_v6 = vadd.f32 %v60_v62, %v59_v54  ;;  %v81_v7 = vrot.slane %v80_v63, 1 }
  0x14   :  { %v88_v8 = vrot.slane %v87_v0, 1  ;;  %v54_v9 = vadd.f32 %v53_v1, %v52_v57  ;;  %v75_v11 = vadd.f32 %v74_v3, %v73_v59  ;;  %v94_v12 = vadd.f32 %v93_v4, %v92_v60 }
  0x15   :  { %v68_v10 = vadd.f32 %v67_v2, %v66_v58  ;;  %v82_v13 = vadd.f32 %v81_v7, %v80_v63  ;;  %v116_v21 = vsub.s32 %v113_v19, %v346_v20  ;;  %vm249_vm5 = vcmask 1041408  }
  0x16   :  { %v89_v15 = vadd.f32 %v88_v8, %v87_v0  ;;  %v95_v16 = vrot.slane %v94_v12, 1  ;;  %v109_v17 = vcombine.low %v47_v5, %v54_v9  ;;  %v314_v50 = vmov 269488144  }
  0x17   :  { %v110_v18 = vcombine.low %v61_v6, %v68_v10  ;;  %v126_v22 = vcombine.low %v75_v11, %v82_v13  ;;  %v263_v51 = vunpack.c.l.s4 %v314_v50 }
  0x18   :  { %v96_v23 = vadd.f32 %v95_v16, %v94_v12  ;;  %v117_v24 = vrot.slane %v109_v17, %v116_v21 }
  0x19   :  { %v124_v25 = vrot.slane %v110_v18, %v116_v21  ;;  %v134_v27 = vrot.slane %v126_v22, %v116_v21  ;;  %v264_v52 = vunpack.c.0.s8 %v263_v51 }
  0x1a   :  { %v127_v26 = vcombine.low %v89_v15, %v96_v23 }
  0x1b   :  { %v125_v29 = vcombine.low %v117_v24, %v124_v25  ;;  %v267_v53 = vsub.s32 %v264_v52, %v346_v20 }
  0x1c   :  { %v141_v28 = vrot.slane %v127_v26, %v116_v21 }
  0x1e   :  { %v142_v30 = vcombine.low %v134_v27, %v141_v28 }
  0x20   :  { %v147_v31 = vrot.slane %v142_v30, 7 }
  0x22   :  { %v149_v32 = vsel %vm148_vm1, %v147_v31, %v125_v29 }
  0x23   :  { %v151_v33 = vsel %vm150_vm2, %v147_v31, %v149_v32 }
  0x24   :  { %v153_v34 = vsel %vm152_vm3, %v147_v31, %v151_v33 }
  0x25   :  { %v155_v35 = vsel %vm154_vm4, %v147_v31, %v153_v34 }
  0x26   :  { %v225_v14 = vmul.f32 0.25, %v155_v35 }
  0x28   :  { %v226_v19 = vmul.f32 %v225_v14, %v225_v14 }
  0x2a   :  { %v228_v36 = vcombine.high %v226_v19, %v226_v19  ;;  %v235_v37 = vrot.slane %v226_v19, %v116_v21 }
  0x2c   :  { %v242_v38 = vrot.slane %v228_v36, %v116_v21  ;;  %v243_v39 = vcombine.high %v235_v37, %v235_v37  ;;  %v250_v40 = vsel %vm249_vm5, %v235_v37, 0.0 }
  0x2e   :  { %v244_v41 = vcombine.high %v242_v38, %v242_v38  ;;  %v251_v42 = vsel %vm249_vm5, %v243_v39, 0.0  ;;  %v253_v43 = vsel %vm249_vm5, %v242_v38, 0.0 }
  0x2f   :  { %v252_v44 = vadd.f32 %v251_v42, %v250_v40 }
  0x30   :  { %v255_v45 = vsel %vm249_vm5, %v244_v41, 0.0 }
  0x31   :  { %v254_v46 = vadd.f32 %v253_v43, %v252_v44 }
  0x33   :  { %v256_v47 = vadd.f32 %v255_v45, %v254_v46 }
  0x35   :  { %257 = vadd.xlane.f32.xlu0 %v256_v47 }
  0xbe   :  { %v258_v48 = vpop.xlane.xlu0 %257 }
  0xbf   :  { %v259_v49 = vadd.f32 1e-12, %v258_v48 }
  0xc1   :  { %289 = vrsqrt.f32 %v259_v49 }
  0xce   :  { %v290_v54 = vpop.eup %289 }
  0xcf   :  { %v268_v55 = vrot.slane %v290_v54, %v267_v53 }
  0xd1   :  { %v270_v56 = vmul.f32 %v268_v55, %v225_v14 }
  0xd3   :  { %271 = vst [vmem:[#allocation2] sm:$0xff] %v270_v56 }
  0xd4   :  { %302 = shalt.err (!%p299_p4)
}
  0xd5   :  { %281 = dma.vmem_to_hbm [thread:$0]  %s279_s1, 128, %s365_s2, [#allocation3]  }
  0xd6   :  { %311 = dma.done.wait [#allocation3], 128  }
  0xd7   :  { %312 = vsyncadd [#allocation3], 4294967168 }
  0xd8   :  { %285 = vsyncpa [#allocation3], 1 }

</bundles_post_ra>
